<compile_context>
chip_gen: v6e
topology: v6e:2x2x1
jax: 0.10.0
libtpu: 0.0.40
codegen_flags: <defaults>
</compile_context>

<pallas_src>
import functools
import math

import jax
import jax.numpy as jnp
from jax.experimental import pallas as pl
from jax.experimental.pallas import tpu as pltpu

BN_EPS = 1e-5
BN_SCALE = 1.0 / math.sqrt(1.0 + BN_EPS)   # eval-mode BatchNorm1d with default params
MXU_DTYPE = jnp.bfloat16                   # matmul operand dtype (f32 accumulation)


# --------------------------------------------------------------------------------------
# The single fused kernel
# --------------------------------------------------------------------------------------
def _ple_kernel(*refs, num_tasks, spec_num, shared_num, num_levels,
                expert_dims, gate_dims, tower_dims, offsets):
    """refs = [x_tokens, w_embed, <packed weights in init order...>, out]."""
    x_ref, w_embed_ref = refs[0], refs[1]
    out_ref = refs[-1]
    w_iter = iter(refs[2:-1])

    T = num_tasks
    Le, Lg = len(expert_dims), len(gate_dims)
    H1, D = expert_dims[0], expert_dims[-1]
    n_stream_arrays = 2 + 2 * (Le - 1) + 2 * (Lg - 1) + 1
    bb = x_ref.shape[0]

    def dot(a, w):
        return jnp.dot(a.astype(w.dtype), w, preferred_element_type=jnp.float32)

    # ---- 1) embedding: multi-hot, one matmul against the block-diag packed table ----
    xt = x_ref[...]                                            # [bb, num_fields] int32
    vpad = w_embed_ref.shape[0]
    lane = jax.lax.broadcasted_iota(jnp.int32, (bb, vpad), 1)
    mh = jnp.zeros((bb, vpad), jnp.float32)
    for f, off in enumerate(offsets):                          # per-field one-hot (disjoint)
        mh = mh + (lane == (xt[:, f:f + 1] + off)).astype(jnp.float32)
    embed_x = dot(mh, w_embed_ref[...])                        # [bb, n_fields*embed_dim] f32

    # ---- helpers -------------------------------------------------------------------
    def stream_forward(x, ws, n_exp, need_gate):
        """One input stream: all its experts (lane-concat / block-diag) + its gate."""
        it = iter(ws)
        w1, b1 = next(it), next(it)
        h = jnp.maximum(dot(x, w1) + b1, 0.0)                  # [bb, n_exp*H1 + G1]
        split = n_exp * H1
        he, hg = h[:, :split], h[:, split:]
        for _ in range(Le - 1):                                # block-diag across experts
            w, b = next(it), next(it)
            he = jnp.maximum(dot(he, w) + b, 0.0)
        for _ in range(Lg - 1):
            w, b = next(it), next(it)
            hg = jnp.maximum(dot(hg, w) + b, 0.0)
        if not need_gate:
            return he, None
        logits = dot(hg, next(it))                             # bias-free gate final
        m = jnp.max(logits, axis=-1, keepdims=True)
        ex = jnp.exp(logits - m)
        p = ex * pl.reciprocal(jnp.sum(ex, axis=-1, keepdims=True), approx=True)
        return he, p                                           # he: [bb, n_exp*D] lane-concat

    def mix_consts(n):
        """expand: [n, n*D] with expand[k, k*D+j]=1; reduce: [n*D, D] with
        reduce[k*D+j, j]=1.  Built from iota (no passed-in constants, no int div)."""
        nd = n * D
        col = jax.lax.broadcasted_iota(jnp.int32, (n, nd), 1)
        row = jax.lax.broadcasted_iota(jnp.int32, (n, nd), 0)
        expand = jnp.logical_and(col >= row * D, col < row * D + D).astype(jnp.float32)
        r2 = jax.lax.broadcasted_iota(jnp.int32, (nd, D), 0)
        c2 = jax.lax.broadcasted_iota(jnp.int32, (nd, D), 1)
        acc = None
        for k in range(n):
            hit = r2 == (c2 + k * D)
            acc = hit if acc is None else jnp.logical_or(acc, hit)
        return expand, acc.astype(jnp.float32)

    def mix(p, e_cat, consts):
        """Weighted sum of lane-concatenated experts without lane slicing:
        out[:, j] = sum_k p[:, k] * e_cat[:, k*D + j]."""
        expand, reduce = consts
        pb = jnp.dot(p, expand, preferred_element_type=jnp.float32)          # [bb, n*D]
        return jnp.dot(pb * e_cat, reduce, preferred_element_type=jnp.float32)  # [bb, D]

    task_consts = mix_consts(spec_num + shared_num)
    shared_consts = mix_consts(T * spec_num + shared_num)

    # ---- 2) CGC levels (activations stay resident; no HBM between levels) -----------
    xs = [embed_x] * (T + 1)
    for lvl in range(num_levels):
        task_refs = [next(w_iter) for _ in range(n_stream_arrays)]    # stacked over tasks
        shared_refs = [next(w_iter) for _ in range(n_stream_arrays)]
        last = lvl == num_levels - 1

        t_he, t_p = [], []
        for i in range(T):
            he, p = stream_forward(xs[i], [r[i] for r in task_refs], spec_num, True)
            t_he.append(he)
            t_p.append(p)
        # The shared CGC output is unused after the last level -> skip its gate + mix.
        s_he, s_p = stream_forward(xs[T], [r[...] for r in shared_refs], shared_num,
                                   not last)

        nxt = []
        for i in range(T):
            e_cat = jnp.concatenate([t_he[i], s_he], axis=-1)    # [spec_i..., shared...]
            nxt.append(mix(t_p[i], e_cat, task_consts))
        if not last:
            e_all = jnp.concatenate(t_he + [s_he], axis=-1)      # task-major spec + shared
            nxt.append(mix(s_p, e_all, shared_consts))
        xs = nxt

    # ---- 3) towers (block-diag across tasks) + sigmoid heads; ONE store -------------
    h = jnp.concatenate(xs[:T], axis=-1)                         # [bb, T*D]
    for _ in range(len(tower_dims)):
        w, b = next(w_iter), next(w_iter)
        h = jnp.maximum(dot(h, w[...]) + b[...], 0.0)
    logit = dot(h, next(w_iter)[...])                            # [bb, T]
    out_ref[...] = (1.0 / (1.0 + jnp.exp(-logit))).astype(out_ref.dtype)


# --------------------------------------------------------------------------------------
# pallas_call wrapper
# --------------------------------------------------------------------------------------
def _zero_map(b, *, nd):
    return (0,) * nd


def _round_up(x, m):
    return -(-x // m) * m


def _pick_bb(batch):
    """Batch tile: multiple of 8; >=2 tiles when possible so the 'parallel' batch axis
    can split across v7x's two TensorCores; capped so per-tile activations stay tiny
    even under v7x's 64 MiB VMEM."""
    cap = 1024
    bp = _round_up(batch, 8)
    if bp <= 8:
        bb = bp
    else:
        bb = min(cap, _round_up(-(-bp // 2), 8))
    return bb, _round_up(bp, bb)


def ple_forward(packed, x_tokens, *, offsets, num_tasks, specific_expert_num,
                shared_expert_num, num_levels, expert_mlp_dims, gate_mlp_dims,
                tower_mlp_dims):
    batch, n_fields = x_tokens.shape
    bb, batch_pad = _pick_bb(batch)
    if batch_pad != batch:
        x_tokens = jnp.pad(x_tokens, ((0, batch_pad - batch), (0, 0)))

    flat = [packed["embed"]] + list(packed["flat"])

    kern = functools.partial(
        _ple_kernel,
        num_tasks=num_tasks, spec_num=specific_expert_num, shared_num=shared_expert_num,
        num_levels=num_levels, expert_dims=tuple(expert_mlp_dims),
        gate_dims=tuple(gate_mlp_dims), tower_dims=tuple(tower_mlp_dims),
        offsets=tuple(offsets))

    in_specs = [pl.BlockSpec((bb, n_fields), lambda b: (b, 0))]
    for w in flat:
        in_specs.append(pl.BlockSpec(w.shape, functools.partial(_zero_map, nd=w.ndim)))

    wbytes = sum(int(a.size) * a.dtype.itemsize for a in flat)
    vmem_limit = int(min(48 << 20, max(16 << 20, 4 * wbytes + bb * 16384 + (8 << 20))))

    out = pl.pallas_call(
        kern,
        out_shape=jax.ShapeDtypeStruct((batch_pad, num_tasks), jnp.float32),
        grid=(batch_pad // bb,),
        in_specs=in_specs,
        out_specs=pl.BlockSpec((bb, num_tasks), lambda b: (b, 0)),
        compiler_params=pltpu.CompilerParams(
            dimension_semantics=("parallel",),
            vmem_limit_bytes=vmem_limit),
    )(x_tokens, *flat)
    return out[:batch]


# --------------------------------------------------------------------------------------
# Parameter init (PyTorch-Linear-like uniform) + packing for the kernel
# --------------------------------------------------------------------------------------
class KeyGen:
    def __init__(self, key):
        self.key = key

    def __call__(self):
        self.key, sub = jax.random.split(self.key)
        return sub


def _init_linear(key, fan_in, fan_out, bias=True):
    kw, kb = jax.random.split(key)
    bound = 1.0 / math.sqrt(fan_in)
    w = jax.random.uniform(kw, (fan_in, fan_out), jnp.float32, -bound, bound)
    if bias:
        b = jax.random.uniform(kb, (fan_out,), jnp.float32, -bound, bound)
        return {"w": w, "b": b}
    return {"w": w}


def _init_mlp(keygen, in_dim, hidden_dims):
    layers, d = [], in_dim
    for h in hidden_dims:
        layers.append(_init_linear(keygen(), d, h))
        d = h
    return layers


def _block_diag(mats):
    rows = sum(m.shape[0] for m in mats)
    cols = sum(m.shape[1] for m in mats)
    out = jnp.zeros((rows, cols), jnp.float32)
    r = c = 0
    for m in mats:
        out = out.at[r:r + m.shape[0], c:c + m.shape[1]].set(m)
        r += m.shape[0]
        c += m.shape[1]
    return out


def _pack_stream(experts, gate, gate_final_w, Le, Lg):
    """Pack one input stream: layer 1 of all experts + gate lane-concatenated; deeper
    expert layers block-diagonal; eval-mode BN scale folded in."""
    arrs = []
    w1 = jnp.concatenate([e[0]["w"] for e in experts] + [gate[0]["w"]], axis=1) * BN_SCALE
    b1 = jnp.concatenate([e[0]["b"] for e in experts] + [gate[0]["b"]], axis=0) * BN_SCALE
    arrs += [w1.astype(MXU_DTYPE), b1.reshape(1, -1)]
    for k in range(1, Le):
        wk = _block_diag([e[k]["w"] for e in experts]) * BN_SCALE
        bk = jnp.concatenate([e[k]["b"] for e in experts], axis=0) * BN_SCALE
        arrs += [wk.astype(MXU_DTYPE), bk.reshape(1, -1)]
    for k in range(1, Lg):
        arrs += [(gate[k]["w"] * BN_SCALE).astype(MXU_DTYPE),
                 (gate[k]["b"] * BN_SCALE).reshape(1, -1)]
    arrs.append(gate_final_w.astype(MXU_DTYPE))                 # bias-free gate final
    return arrs


def init_raw_params(key, field_dims, embed_dim, shared_expert_num, specific_expert_num,
                    num_levels, expert_mlp_dims, gate_mlp_dims, tower_mlp_dims, num_tasks):
    kg = KeyGen(key)
    total_vocab = sum(field_dims)
    embed_out = len(field_dims) * embed_dim
    offsets, off = [], 0
    for fd in field_dims:
        offsets.append(off)
        off += fd

    raw = {"table": 0.1 * jax.random.normal(kg(), (total_vocab, embed_dim), jnp.float32),
           "offsets": tuple(offsets)}
    spec_gate_out = specific_expert_num + shared_expert_num
    shared_gate_out = num_tasks * specific_expert_num + shared_expert_num

    levels = []
    for lvl in range(num_levels):
        in_dim = embed_out if lvl == 0 else expert_mlp_dims[-1]
        levels.append({
            "spec_experts": [[_init_mlp(kg, in_dim, expert_mlp_dims)
                              for _ in range(specific_expert_num)]
                             for _ in range(num_tasks)],
            # PyTorch builds specific_expert_num shared experts; forward uses shared_expert_num.
            "shared_experts": [_init_mlp(kg, in_dim, expert_mlp_dims)
                               for _ in range(specific_expert_num)],
            "spec_gate": [_init_mlp(kg, in_dim, gate_mlp_dims) for _ in range(num_tasks)],
            "spec_gate_final": [
                _init_linear(kg(), gate_mlp_dims[-1], spec_gate_out, bias=False)["w"]
                for _ in range(num_tasks)],
            "shared_gate": _init_mlp(kg, in_dim, gate_mlp_dims),
            "shared_gate_final": _init_linear(kg(), gate_mlp_dims[-1], shared_gate_out,
                                              bias=False)["w"],
        })
    raw["levels"] = levels
    raw["towers"] = [_init_mlp(kg, expert_mlp_dims[-1], tower_mlp_dims)
                     for _ in range(num_tasks)]
    raw["tower_final"] = [_init_linear(kg(), tower_mlp_dims[-1], 1, bias=False)["w"]
                          for _ in range(num_tasks)]
    return raw


def pack_params(raw, field_dims, embed_dim, expert_mlp_dims, gate_mlp_dims,
                tower_mlp_dims, num_tasks, specific_expert_num, shared_expert_num,
                num_levels):
    offsets = raw["offsets"]
    total_vocab = sum(field_dims)
    vpad = _round_up(max(total_vocab, 128), 128)
    embed_out = len(field_dims) * embed_dim
    Le, Lg = len(expert_mlp_dims), len(gate_mlp_dims)

    # Block-diagonal packed embedding table: field f's vocab rows only touch its columns.
    w_embed = jnp.zeros((vpad, embed_out), jnp.float32)
    for f, fd in enumerate(field_dims):
        w_embed = w_embed.at[offsets[f]:offsets[f] + fd,
                             f * embed_dim:(f + 1) * embed_dim].set(
            raw["table"][offsets[f]:offsets[f] + fd])

    flat = []
    for lvl in range(num_levels):
        L = raw["levels"][lvl]
        per_task = [_pack_stream(L["spec_experts"][i], L["spec_gate"][i],
                                 L["spec_gate_final"][i], Le, Lg)
                    for i in range(num_tasks)]
        for arrs in zip(*per_task):                 # stack identical-shaped task arrays
            flat.append(jnp.stack(arrs, axis=0))
        flat += _pack_stream(L["shared_experts"][:shared_expert_num],
                             L["shared_gate"], L["shared_gate_final"], Le, Lg)

    for k in range(len(tower_mlp_dims)):            # towers block-diag across tasks
        wk = _block_diag([raw["towers"][i][k]["w"] for i in range(num_tasks)]) * BN_SCALE
        bk = jnp.concatenate([raw["towers"][i][k]["b"] for i in range(num_tasks)],
                             axis=0) * BN_SCALE
        flat += [wk.astype(MXU_DTYPE), bk.reshape(1, -1)]
    flat.append(_block_diag([raw["tower_final"][i] for i in range(num_tasks)])
                .astype(MXU_DTYPE))
    return {"embed": w_embed.astype(MXU_DTYPE), "flat": flat}


# --------------------------------------------------------------------------------------
# Pure-JAX reference (f32, eval-mode BN) for correctness checking
# --------------------------------------------------------------------------------------
def ple_reference(raw, x_tokens, *, num_tasks, specific_expert_num, shared_expert_num,
                  num_levels):
    def mlp(layers, h):
        for layer in layers:
            h = jnp.maximum((h @ layer["w"] + layer["b"]) * BN_SCALE, 0.0)
        return h

    idx = x_tokens + jnp.array(raw["offsets"], jnp.int32)[None, :]
    emb = raw["table"][idx].reshape(x_tokens.shape[0], -1)
    inputs = [emb] * (num_tasks + 1)
    for lvl in range(num_levels):
        L = raw["levels"][lvl]
        spec_outs = []
        for i in range(num_tasks):
            for j in range(specific_expert_num):
                spec_outs.append(mlp(L["spec_experts"][i][j], inputs[i]))
        shared_outs = [mlp(L["shared_experts"][k], inputs[-1])
                       for k in range(shared_expert_num)]
        outs = []
        for i in range(num_tasks):
            cur = jnp.stack(spec_outs[i * specific_expert_num:
                                      (i + 1) * specific_expert_num] + shared_outs, axis=1)
            g = mlp(L["spec_gate"][i], inputs[i]) @ L["spec_gate_final"][i]
            outs.append(jnp.einsum("bn,bnd->bd", jax.nn.softmax(g, axis=-1), cur))
        cur = jnp.stack(spec_outs + shared_outs, axis=1)
        g = mlp(L["shared_gate"], inputs[-1]) @ L["shared_gate_final"]
        outs.append(jnp.einsum("bn,bnd->bd", jax.nn.softmax(g, axis=-1), cur))
        inputs = outs
    preds = []
    for i in range(num_tasks):
        h = mlp(raw["towers"][i], inputs[i])
        preds.append(jax.nn.sigmoid(h @ raw["tower_final"][i]))
    return jnp.concatenate(preds, axis=-1)


# --------------------------------------------------------------------------------------
# Main
# --------------------------------------------------------------------------------------
if __name__ == "__main__":
    field_dims = [10, 20, 30, 40]
    embed_dim = 8
    shared_expert_num = 2
    specific_expert_num = 2
    num_levels = 2
    expert_mlp_dims = [64, 32]
    gate_mlp_dims = [16]
    tower_mlp_dims = [16]
    num_tasks = 2
    batch = 8

    key = jax.random.PRNGKey(0)
    k_params, k_x = jax.random.split(key)

    raw = init_raw_params(k_params, field_dims, embed_dim, shared_expert_num,
                          specific_expert_num, num_levels, expert_mlp_dims,
                          gate_mlp_dims, tower_mlp_dims, num_tasks)
    packed = pack_params(raw, field_dims, embed_dim, expert_mlp_dims, gate_mlp_dims,
                         tower_mlp_dims, num_tasks, specific_expert_num,
                         shared_expert_num, num_levels)

    # deterministic token ids per field, each within its field's vocab
    cols = []
    for f, fd in enumerate(field_dims):
        cols.append(jax.random.randint(jax.random.fold_in(k_x, f), (batch,), 0, fd))
    x = jnp.stack(cols, axis=1).astype(jnp.int32)   # [batch, num_fields]

    fwd = jax.jit(functools.partial(
        ple_forward, offsets=raw["offsets"], num_tasks=num_tasks,
        specific_expert_num=specific_expert_num, shared_expert_num=shared_expert_num,
        num_levels=num_levels, expert_mlp_dims=tuple(expert_mlp_dims),
        gate_mlp_dims=tuple(gate_mlp_dims), tower_mlp_dims=tuple(tower_mlp_dims)))

    out = jax.block_until_ready(fwd(packed, x))
    ref = ple_reference(raw, x, num_tasks=num_tasks,
                        specific_expert_num=specific_expert_num,
                        shared_expert_num=shared_expert_num, num_levels=num_levels)

    assert out.shape == (batch, num_tasks), out.shape
    assert bool(jnp.all(jnp.isfinite(out)))
    assert bool(jnp.all((out >= 0.0) & (out <= 1.0)))
    max_err = float(jnp.max(jnp.abs(out - ref)))
    assert max_err < 3e-2, f"max abs error vs f32 reference: {max_err}"
    print("KERNEL_OK")
</pallas_src>

<mosaic_0001>
module attributes {stable_mosaic.version = 11 : i64} {
  func.func @_ple_kernel(%arg0: i32, %arg1: memref<8x4xi32, #tpu.memory_space<vmem>>, %arg2: memref<128x32xbf16, #tpu.memory_space<vmem>>, %arg3: memref<2x32x144xbf16, #tpu.memory_space<vmem>>, %arg4: memref<2x1x144xf32, #tpu.memory_space<vmem>>, %arg5: memref<2x128x64xbf16, #tpu.memory_space<vmem>>, %arg6: memref<2x1x64xf32, #tpu.memory_space<vmem>>, %arg7: memref<2x16x4xbf16, #tpu.memory_space<vmem>>, %arg8: memref<32x144xbf16, #tpu.memory_space<vmem>>, %arg9: memref<1x144xf32, #tpu.memory_space<vmem>>, %arg10: memref<128x64xbf16, #tpu.memory_space<vmem>>, %arg11: memref<1x64xf32, #tpu.memory_space<vmem>>, %arg12: memref<16x6xbf16, #tpu.memory_space<vmem>>, %arg13: memref<2x32x144xbf16, #tpu.memory_space<vmem>>, %arg14: memref<2x1x144xf32, #tpu.memory_space<vmem>>, %arg15: memref<2x128x64xbf16, #tpu.memory_space<vmem>>, %arg16: memref<2x1x64xf32, #tpu.memory_space<vmem>>, %arg17: memref<2x16x4xbf16, #tpu.memory_space<vmem>>, %arg18: memref<32x144xbf16, #tpu.memory_space<vmem>>, %arg19: memref<1x144xf32, #tpu.memory_space<vmem>>, %arg20: memref<128x64xbf16, #tpu.memory_space<vmem>>, %arg21: memref<1x64xf32, #tpu.memory_space<vmem>>, %arg22: memref<16x6xbf16, #tpu.memory_space<vmem>>, %arg23: memref<64x32xbf16, #tpu.memory_space<vmem>>, %arg24: memref<1x32xf32, #tpu.memory_space<vmem>>, %arg25: memref<32x2xbf16, #tpu.memory_space<vmem>>, %arg26: memref<8x2xf32, #tpu.memory_space<vmem>>) attributes {dimension_semantics = [#tpu.dimension_semantics<parallel>], iteration_bounds = array<i64: 1>, scalar_prefetch = 0 : i64, scratch_operands = 0 : i64, tpu.core_type = #tpu.core_type<tc>, window_params = [{transform_indices = @transform_0, window_bounds = array<i64: 8, 4>}, {pipeline_mode = #tpu.pipeline_mode<synchronous>, transform_indices = @transform_1, window_bounds = array<i64: 128, 32>}, {pipeline_mode = #tpu.pipeline_mode<synchronous>, transform_indices = @transform_2, window_bounds = array<i64: 2, 32, 144>}, {pipeline_mode = #tpu.pipeline_mode<synchronous>, transform_indices = @transform_3, window_bounds = array<i64: 2, 1, 144>}, {pipeline_mode = #tpu.pipeline_mode<synchronous>, transform_indices = @transform_4, window_bounds = array<i64: 2, 128, 64>}, {pipeline_mode = #tpu.pipeline_mode<synchronous>, transform_indices = @transform_5, window_bounds = array<i64: 2, 1, 64>}, {pipeline_mode = #tpu.pipeline_mode<synchronous>, transform_indices = @transform_6, window_bounds = array<i64: 2, 16, 4>}, {pipeline_mode = #tpu.pipeline_mode<synchronous>, transform_indices = @transform_7, window_bounds = array<i64: 32, 144>}, {pipeline_mode = #tpu.pipeline_mode<synchronous>, transform_indices = @transform_8, window_bounds = array<i64: 1, 144>}, {pipeline_mode = #tpu.pipeline_mode<synchronous>, transform_indices = @transform_9, window_bounds = array<i64: 128, 64>}, {pipeline_mode = #tpu.pipeline_mode<synchronous>, transform_indices = @transform_10, window_bounds = array<i64: 1, 64>}, {pipeline_mode = #tpu.pipeline_mode<synchronous>, transform_indices = @transform_11, window_bounds = array<i64: 16, 6>}, {pipeline_mode = #tpu.pipeline_mode<synchronous>, transform_indices = @transform_12, window_bounds = array<i64: 2, 32, 144>}, {pipeline_mode = #tpu.pipeline_mode<synchronous>, transform_indices = @transform_13, window_bounds = array<i64: 2, 1, 144>}, {pipeline_mode = #tpu.pipeline_mode<synchronous>, transform_indices = @transform_14, window_bounds = array<i64: 2, 128, 64>}, {pipeline_mode = #tpu.pipeline_mode<synchronous>, transform_indices = @transform_15, window_bounds = array<i64: 2, 1, 64>}, {pipeline_mode = #tpu.pipeline_mode<synchronous>, transform_indices = @transform_16, window_bounds = array<i64: 2, 16, 4>}, {pipeline_mode = #tpu.pipeline_mode<synchronous>, transform_indices = @transform_17, window_bounds = array<i64: 32, 144>}, {pipeline_mode = #tpu.pipeline_mode<synchronous>, transform_indices = @transform_18, window_bounds = array<i64: 1, 144>}, {pipeline_mode = #tpu.pipeline_mode<synchronous>, transform_indices = @transform_19, window_bounds = array<i64: 128, 64>}, {pipeline_mode = #tpu.pipeline_mode<synchronous>, transform_indices = @transform_20, window_bounds = array<i64: 1, 64>}, {pipeline_mode = #tpu.pipeline_mode<synchronous>, transform_indices = @transform_21, window_bounds = array<i64: 16, 6>}, {pipeline_mode = #tpu.pipeline_mode<synchronous>, transform_indices = @transform_22, window_bounds = array<i64: 64, 32>}, {pipeline_mode = #tpu.pipeline_mode<synchronous>, transform_indices = @transform_23, window_bounds = array<i64: 1, 32>}, {pipeline_mode = #tpu.pipeline_mode<synchronous>, transform_indices = @transform_24, window_bounds = array<i64: 32, 2>}, {transform_indices = @transform_25, window_bounds = array<i64: 8, 2>}]} {
    %c0 = arith.constant 0 : index
    %c0_0 = arith.constant 0 : index
    %0 = vector.load %arg1[%c0, %c0_0] : memref<8x4xi32, #tpu.memory_space<vmem>>, vector<8x4xi32>
    %1 = tpu.iota {dimensions = array<i32: 1>} : vector<8x128xi32>
    %cst = arith.constant 0.000000e+00 : f32
    %2 = vector.broadcast %cst : f32 to vector<8x128xf32>
    %3 = vector.extract_strided_slice %0 {offsets = [0, 0], sizes = [8, 1], strides = [1, 1]} : vector<8x4xi32> to vector<8x1xi32>
    %c0_i32 = arith.constant 0 : i32
    %4 = vector.broadcast %c0_i32 : i32 to vector<8x1xi32>
    %5 = arith.addi %3, %4 : vector<8x1xi32>
    %6 = vector.broadcast %5 : vector<8x1xi32> to vector<8x128xi32>
    %7 = arith.cmpi eq, %1, %6 : vector<8x128xi32>
    %8 = arith.extui %7 : vector<8x128xi1> to vector<8x128xi32>
    %9 = arith.sitofp %8 : vector<8x128xi32> to vector<8x128xf32>
    %10 = arith.addf %2, %9 : vector<8x128xf32>
    %11 = vector.extract_strided_slice %0 {offsets = [0, 1], sizes = [8, 1], strides = [1, 1]} : vector<8x4xi32> to vector<8x1xi32>
    %c10_i32 = arith.constant 10 : i32
    %12 = vector.broadcast %c10_i32 : i32 to vector<8x1xi32>
    %13 = arith.addi %11, %12 : vector<8x1xi32>
    %14 = vector.broadcast %13 : vector<8x1xi32> to vector<8x128xi32>
    %15 = arith.cmpi eq, %1, %14 : vector<8x128xi32>
    %16 = arith.extui %15 : vector<8x128xi1> to vector<8x128xi32>
    %17 = arith.sitofp %16 : vector<8x128xi32> to vector<8x128xf32>
    %18 = arith.addf %10, %17 : vector<8x128xf32>
    %19 = vector.extract_strided_slice %0 {offsets = [0, 2], sizes = [8, 1], strides = [1, 1]} : vector<8x4xi32> to vector<8x1xi32>
    %c30_i32 = arith.constant 30 : i32
    %20 = vector.broadcast %c30_i32 : i32 to vector<8x1xi32>
    %21 = arith.addi %19, %20 : vector<8x1xi32>
    %22 = vector.broadcast %21 : vector<8x1xi32> to vector<8x128xi32>
    %23 = arith.cmpi eq, %1, %22 : vector<8x128xi32>
    %24 = arith.extui %23 : vector<8x128xi1> to vector<8x128xi32>
    %25 = arith.sitofp %24 : vector<8x128xi32> to vector<8x128xf32>
    %26 = arith.addf %18, %25 : vector<8x128xf32>
    %27 = vector.extract_strided_slice %0 {offsets = [0, 3], sizes = [8, 1], strides = [1, 1]} : vector<8x4xi32> to vector<8x1xi32>
    %c60_i32 = arith.constant 60 : i32
    %28 = vector.broadcast %c60_i32 : i32 to vector<8x1xi32>
    %29 = arith.addi %27, %28 : vector<8x1xi32>
    %30 = vector.broadcast %29 : vector<8x1xi32> to vector<8x128xi32>
    %31 = arith.cmpi eq, %1, %30 : vector<8x128xi32>
    %32 = arith.extui %31 : vector<8x128xi1> to vector<8x128xi32>
    %33 = arith.sitofp %32 : vector<8x128xi32> to vector<8x128xf32>
    %34 = arith.addf %26, %33 : vector<8x128xf32>
    %c0_1 = arith.constant 0 : index
    %c0_2 = arith.constant 0 : index
    %35 = vector.load %arg2[%c0_1, %c0_2] : memref<128x32xbf16, #tpu.memory_space<vmem>>, vector<128x32xbf16>
    %36 = arith.truncf %34 : vector<8x128xf32> to vector<8x128xbf16>
    %cst_3 = arith.constant dense<0.000000e+00> : vector<8x32xf32>
    %37 = tpu.matmul %36, %35, %cst_3 {dimension_numbers = #tpu.dot_dimension_numbers<[1], [0], [0], [1], [0, 0, 1, 1], [], []>} : vector<8x128xbf16>, vector<128x32xbf16>, vector<8x32xf32> -> vector<8x32xf32>
    %38 = tpu.iota {dimensions = array<i32: 1>} : vector<4x128xi32>
    %39 = tpu.iota {dimensions = array<i32: 0>} : vector<4x128xi32>
    %c32_i32 = arith.constant 32 : i32
    %40 = vector.broadcast %c32_i32 : i32 to vector<4x128xi32>
    %41 = arith.muli %39, %40 : vector<4x128xi32>
    %42 = arith.cmpi sge, %38, %41 : vector<4x128xi32>
    %c32_i32_4 = arith.constant 32 : i32
    %43 = vector.broadcast %c32_i32_4 : i32 to vector<4x128xi32>
    %44 = arith.muli %39, %43 : vector<4x128xi32>
    %c32_i32_5 = arith.constant 32 : i32
    %45 = vector.broadcast %c32_i32_5 : i32 to vector<4x128xi32>
    %46 = arith.addi %44, %45 : vector<4x128xi32>
    %47 = arith.cmpi slt, %38, %46 : vector<4x128xi32>
    %48 = arith.andi %42, %47 : vector<4x128xi1>
    %49 = arith.extui %48 : vector<4x128xi1> to vector<4x128xi32>
    %50 = arith.sitofp %49 : vector<4x128xi32> to vector<4x128xf32>
    %51 = tpu.iota {dimensions = array<i32: 0>} : vector<128x32xi32>
    %52 = tpu.iota {dimensions = array<i32: 1>} : vector<128x32xi32>
    %c0_i32_6 = arith.constant 0 : i32
    %53 = vector.broadcast %c0_i32_6 : i32 to vector<128x32xi32>
    %54 = arith.addi %52, %53 : vector<128x32xi32>
    %55 = arith.cmpi eq, %51, %54 : vector<128x32xi32>
    %c32_i32_7 = arith.constant 32 : i32
    %56 = vector.broadcast %c32_i32_7 : i32 to vector<128x32xi32>
    %57 = arith.addi %52, %56 : vector<128x32xi32>
    %58 = arith.cmpi eq, %51, %57 : vector<128x32xi32>
    %59 = arith.ori %55, %58 : vector<128x32xi1>
    %c64_i32 = arith.constant 64 : i32
    %60 = vector.broadcast %c64_i32 : i32 to vector<128x32xi32>
    %61 = arith.addi %52, %60 : vector<128x32xi32>
    %62 = arith.cmpi eq, %51, %61 : vector<128x32xi32>
    %63 = arith.ori %59, %62 : vector<128x32xi1>
    %c96_i32 = arith.constant 96 : i32
    %64 = vector.broadcast %c96_i32 : i32 to vector<128x32xi32>
    %65 = arith.addi %52, %64 : vector<128x32xi32>
    %66 = arith.cmpi eq, %51, %65 : vector<128x32xi32>
    %67 = arith.ori %63, %66 : vector<128x32xi1>
    %68 = arith.extui %67 : vector<128x32xi1> to vector<128x32xi32>
    %69 = arith.sitofp %68 : vector<128x32xi32> to vector<128x32xf32>
    %70 = tpu.iota {dimensions = array<i32: 1>} : vector<6x192xi32>
    %71 = tpu.iota {dimensions = array<i32: 0>} : vector<6x192xi32>
    %c32_i32_8 = arith.constant 32 : i32
    %72 = vector.broadcast %c32_i32_8 : i32 to vector<6x192xi32>
    %73 = arith.muli %71, %72 : vector<6x192xi32>
    %74 = arith.cmpi sge, %70, %73 : vector<6x192xi32>
    %c32_i32_9 = arith.constant 32 : i32
    %75 = vector.broadcast %c32_i32_9 : i32 to vector<6x192xi32>
    %76 = arith.muli %71, %75 : vector<6x192xi32>
    %c32_i32_10 = arith.constant 32 : i32
    %77 = vector.broadcast %c32_i32_10 : i32 to vector<6x192xi32>
    %78 = arith.addi %76, %77 : vector<6x192xi32>
    %79 = arith.cmpi slt, %70, %78 : vector<6x192xi32>
    %80 = arith.andi %74, %79 : vector<6x192xi1>
    %81 = arith.extui %80 : vector<6x192xi1> to vector<6x192xi32>
    %82 = arith.sitofp %81 : vector<6x192xi32> to vector<6x192xf32>
    %83 = tpu.iota {dimensions = array<i32: 0>} : vector<192x32xi32>
    %84 = tpu.iota {dimensions = array<i32: 1>} : vector<192x32xi32>
    %c0_i32_11 = arith.constant 0 : i32
    %85 = vector.broadcast %c0_i32_11 : i32 to vector<192x32xi32>
    %86 = arith.addi %84, %85 : vector<192x32xi32>
    %87 = arith.cmpi eq, %83, %86 : vector<192x32xi32>
    %c32_i32_12 = arith.constant 32 : i32
    %88 = vector.broadcast %c32_i32_12 : i32 to vector<192x32xi32>
    %89 = arith.addi %84, %88 : vector<192x32xi32>
    %90 = arith.cmpi eq, %83, %89 : vector<192x32xi32>
    %91 = arith.ori %87, %90 : vector<192x32xi1>
    %c64_i32_13 = arith.constant 64 : i32
    %92 = vector.broadcast %c64_i32_13 : i32 to vector<192x32xi32>
    %93 = arith.addi %84, %92 : vector<192x32xi32>
    %94 = arith.cmpi eq, %83, %93 : vector<192x32xi32>
    %95 = arith.ori %91, %94 : vector<192x32xi1>
    %c96_i32_14 = arith.constant 96 : i32
    %96 = vector.broadcast %c96_i32_14 : i32 to vector<192x32xi32>
    %97 = arith.addi %84, %96 : vector<192x32xi32>
    %98 = arith.cmpi eq, %83, %97 : vector<192x32xi32>
    %99 = arith.ori %95, %98 : vector<192x32xi1>
    %c128_i32 = arith.constant 128 : i32
    %100 = vector.broadcast %c128_i32 : i32 to vector<192x32xi32>
    %101 = arith.addi %84, %100 : vector<192x32xi32>
    %102 = arith.cmpi eq, %83, %101 : vector<192x32xi32>
    %103 = arith.ori %99, %102 : vector<192x32xi1>
    %c160_i32 = arith.constant 160 : i32
    %104 = vector.broadcast %c160_i32 : i32 to vector<192x32xi32>
    %105 = arith.addi %84, %104 : vector<192x32xi32>
    %106 = arith.cmpi eq, %83, %105 : vector<192x32xi32>
    %107 = arith.ori %103, %106 : vector<192x32xi1>
    %108 = arith.extui %107 : vector<192x32xi1> to vector<192x32xi32>
    %109 = arith.sitofp %108 : vector<192x32xi32> to vector<192x32xf32>
    %c0_15 = arith.constant 0 : index
    %c0_16 = arith.constant 0 : index
    %c0_17 = arith.constant 0 : index
    %110 = vector.load %arg3[%c0_15, %c0_16, %c0_17] : memref<2x32x144xbf16, #tpu.memory_space<vmem>>, vector<1x32x144xbf16>
    %111 = vector.shape_cast %110 : vector<1x32x144xbf16> to vector<32x144xbf16>
    %c0_18 = arith.constant 0 : index
    %c0_19 = arith.constant 0 : index
    %c0_20 = arith.constant 0 : index
    %112 = vector.load %arg4[%c0_18, %c0_19, %c0_20] : memref<2x1x144xf32, #tpu.memory_space<vmem>>, vector<1x1x144xf32>
    %113 = vector.shape_cast %112 : vector<1x1x144xf32> to vector<1x144xf32>
    %c0_21 = arith.constant 0 : index
    %c0_22 = arith.constant 0 : index
    %c0_23 = arith.constant 0 : index
    %114 = vector.load %arg5[%c0_21, %c0_22, %c0_23] : memref<2x128x64xbf16, #tpu.memory_space<vmem>>, vector<1x128x64xbf16>
    %115 = vector.shape_cast %114 : vector<1x128x64xbf16> to vector<128x64xbf16>
    %c0_24 = arith.constant 0 : index
    %c0_25 = arith.constant 0 : index
    %c0_26 = arith.constant 0 : index
    %116 = vector.load %arg6[%c0_24, %c0_25, %c0_26] : memref<2x1x64xf32, #tpu.memory_space<vmem>>, vector<1x1x64xf32>
    %117 = vector.shape_cast %116 : vector<1x1x64xf32> to vector<1x64xf32>
    %c0_27 = arith.constant 0 : index
    %c0_28 = arith.constant 0 : index
    %c0_29 = arith.constant 0 : index
    %118 = vector.load %arg7[%c0_27, %c0_28, %c0_29] : memref<2x16x4xbf16, #tpu.memory_space<vmem>>, vector<1x16x4xbf16>
    %119 = vector.shape_cast %118 : vector<1x16x4xbf16> to vector<16x4xbf16>
    %120 = arith.truncf %37 : vector<8x32xf32> to vector<8x32xbf16>
    %cst_30 = arith.constant dense<0.000000e+00> : vector<8x144xf32>
    %121 = tpu.matmul %120, %111, %cst_30 {dimension_numbers = #tpu.dot_dimension_numbers<[1], [0], [0], [1], [0, 0, 1, 1], [], []>} : vector<8x32xbf16>, vector<32x144xbf16>, vector<8x144xf32> -> vector<8x144xf32>
    %122 = vector.broadcast %113 : vector<1x144xf32> to vector<8x144xf32>
    %123 = arith.addf %121, %122 : vector<8x144xf32>
    %cst_31 = arith.constant 0.000000e+00 : f32
    %124 = vector.broadcast %cst_31 : f32 to vector<8x144xf32>
    %125 = arith.maximumf %123, %124 : vector<8x144xf32>
    %126 = vector.extract_strided_slice %125 {offsets = [0, 0], sizes = [8, 128], strides = [1, 1]} : vector<8x144xf32> to vector<8x128xf32>
    %127 = vector.extract_strided_slice %125 {offsets = [0, 128], sizes = [8, 16], strides = [1, 1]} : vector<8x144xf32> to vector<8x16xf32>
    %128 = arith.truncf %126 : vector<8x128xf32> to vector<8x128xbf16>
    %cst_32 = arith.constant dense<0.000000e+00> : vector<8x64xf32>
    %129 = tpu.matmul %128, %115, %cst_32 {dimension_numbers = #tpu.dot_dimension_numbers<[1], [0], [0], [1], [0, 0, 1, 1], [], []>} : vector<8x128xbf16>, vector<128x64xbf16>, vector<8x64xf32> -> vector<8x64xf32>
    %130 = vector.broadcast %117 : vector<1x64xf32> to vector<8x64xf32>
    %131 = arith.addf %129, %130 : vector<8x64xf32>
    %cst_33 = arith.constant 0.000000e+00 : f32
    %132 = vector.broadcast %cst_33 : f32 to vector<8x64xf32>
    %133 = arith.maximumf %131, %132 : vector<8x64xf32>
    %134 = arith.truncf %127 : vector<8x16xf32> to vector<8x16xbf16>
    %cst_34 = arith.constant dense<0.000000e+00> : vector<8x4xf32>
    %135 = tpu.matmul %134, %119, %cst_34 {dimension_numbers = #tpu.dot_dimension_numbers<[1], [0], [0], [1], [0, 0, 1, 1], [], []>} : vector<8x16xbf16>, vector<16x4xbf16>, vector<8x4xf32> -> vector<8x4xf32>
    %cst_35 = arith.constant dense<0xFF800000> : vector<8xf32>
    %136 = vector.multi_reduction <maximumf>, %135, %cst_35 [1] : vector<8x4xf32> to vector<8xf32>
    %137 = vector.shape_cast %136 : vector<8xf32> to vector<8x1xf32>
    %138 = vector.broadcast %137 : vector<8x1xf32> to vector<8x4xf32>
    %139 = arith.subf %135, %138 : vector<8x4xf32>
    %140 = math.exp %139 : vector<8x4xf32>
    %cst_36 = arith.constant dense<0.000000e+00> : vector<8xf32>
    %141 = vector.multi_reduction <add>, %140, %cst_36 [1] : vector<8x4xf32> to vector<8xf32>
    %142 = vector.shape_cast %141 : vector<8xf32> to vector<8x1xf32>
    %143 = tpu.reciprocal %142 {approx = true} : vector<8x1xf32> -> vector<8x1xf32>
    %144 = vector.broadcast %143 : vector<8x1xf32> to vector<8x4xf32>
    %145 = arith.mulf %140, %144 : vector<8x4xf32>
    %c1 = arith.constant 1 : index
    %c0_37 = arith.constant 0 : index
    %c0_38 = arith.constant 0 : index
    %146 = vector.load %arg3[%c1, %c0_37, %c0_38] : memref<2x32x144xbf16, #tpu.memory_space<vmem>>, vector<1x32x144xbf16>
    %147 = vector.shape_cast %146 : vector<1x32x144xbf16> to vector<32x144xbf16>
    %c1_39 = arith.constant 1 : index
    %c0_40 = arith.constant 0 : index
    %c0_41 = arith.constant 0 : index
    %148 = vector.load %arg4[%c1_39, %c0_40, %c0_41] : memref<2x1x144xf32, #tpu.memory_space<vmem>>, vector<1x1x144xf32>
    %149 = vector.shape_cast %148 : vector<1x1x144xf32> to vector<1x144xf32>
    %c1_42 = arith.constant 1 : index
    %c0_43 = arith.constant 0 : index
    %c0_44 = arith.constant 0 : index
    %150 = vector.load %arg5[%c1_42, %c0_43, %c0_44] : memref<2x128x64xbf16, #tpu.memory_space<vmem>>, vector<1x128x64xbf16>
    %151 = vector.shape_cast %150 : vector<1x128x64xbf16> to vector<128x64xbf16>
    %c1_45 = arith.constant 1 : index
    %c0_46 = arith.constant 0 : index
    %c0_47 = arith.constant 0 : index
    %152 = vector.load %arg6[%c1_45, %c0_46, %c0_47] : memref<2x1x64xf32, #tpu.memory_space<vmem>>, vector<1x1x64xf32>
    %153 = vector.shape_cast %152 : vector<1x1x64xf32> to vector<1x64xf32>
    %c1_48 = arith.constant 1 : index
    %c0_49 = arith.constant 0 : index
    %c0_50 = arith.constant 0 : index
    %154 = vector.load %arg7[%c1_48, %c0_49, %c0_50] : memref<2x16x4xbf16, #tpu.memory_space<vmem>>, vector<1x16x4xbf16>
    %155 = vector.shape_cast %154 : vector<1x16x4xbf16> to vector<16x4xbf16>
    %156 = arith.truncf %37 : vector<8x32xf32> to vector<8x32xbf16>
    %cst_51 = arith.constant dense<0.000000e+00> : vector<8x144xf32>
    %157 = tpu.matmul %156, %147, %cst_51 {dimension_numbers = #tpu.dot_dimension_numbers<[1], [0], [0], [1], [0, 0, 1, 1], [], []>} : vector<8x32xbf16>, vector<32x144xbf16>, vector<8x144xf32> -> vector<8x144xf32>
    %158 = vector.broadcast %149 : vector<1x144xf32> to vector<8x144xf32>
    %159 = arith.addf %157, %158 : vector<8x144xf32>
    %cst_52 = arith.constant 0.000000e+00 : f32
    %160 = vector.broadcast %cst_52 : f32 to vector<8x144xf32>
    %161 = arith.maximumf %159, %160 : vector<8x144xf32>
    %162 = vector.extract_strided_slice %161 {offsets = [0, 0], sizes = [8, 128], strides = [1, 1]} : vector<8x144xf32> to vector<8x128xf32>
    %163 = vector.extract_strided_slice %161 {offsets = [0, 128], sizes = [8, 16], strides = [1, 1]} : vector<8x144xf32> to vector<8x16xf32>
    %164 = arith.truncf %162 : vector<8x128xf32> to vector<8x128xbf16>
    %cst_53 = arith.constant dense<0.000000e+00> : vector<8x64xf32>
    %165 = tpu.matmul %164, %151, %cst_53 {dimension_numbers = #tpu.dot_dimension_numbers<[1], [0], [0], [1], [0, 0, 1, 1], [], []>} : vector<8x128xbf16>, vector<128x64xbf16>, vector<8x64xf32> -> vector<8x64xf32>
    %166 = vector.broadcast %153 : vector<1x64xf32> to vector<8x64xf32>
    %167 = arith.addf %165, %166 : vector<8x64xf32>
    %cst_54 = arith.constant 0.000000e+00 : f32
    %168 = vector.broadcast %cst_54 : f32 to vector<8x64xf32>
    %169 = arith.maximumf %167, %168 : vector<8x64xf32>
    %170 = arith.truncf %163 : vector<8x16xf32> to vector<8x16xbf16>
    %cst_55 = arith.constant dense<0.000000e+00> : vector<8x4xf32>
    %171 = tpu.matmul %170, %155, %cst_55 {dimension_numbers = #tpu.dot_dimension_numbers<[1], [0], [0], [1], [0, 0, 1, 1], [], []>} : vector<8x16xbf16>, vector<16x4xbf16>, vector<8x4xf32> -> vector<8x4xf32>
    %cst_56 = arith.constant dense<0xFF800000> : vector<8xf32>
    %172 = vector.multi_reduction <maximumf>, %171, %cst_56 [1] : vector<8x4xf32> to vector<8xf32>
    %173 = vector.shape_cast %172 : vector<8xf32> to vector<8x1xf32>
    %174 = vector.broadcast %173 : vector<8x1xf32> to vector<8x4xf32>
    %175 = arith.subf %171, %174 : vector<8x4xf32>
    %176 = math.exp %175 : vector<8x4xf32>
    %cst_57 = arith.constant dense<0.000000e+00> : vector<8xf32>
    %177 = vector.multi_reduction <add>, %176, %cst_57 [1] : vector<8x4xf32> to vector<8xf32>
    %178 = vector.shape_cast %177 : vector<8xf32> to vector<8x1xf32>
    %179 = tpu.reciprocal %178 {approx = true} : vector<8x1xf32> -> vector<8x1xf32>
    %180 = vector.broadcast %179 : vector<8x1xf32> to vector<8x4xf32>
    %181 = arith.mulf %176, %180 : vector<8x4xf32>
    %c0_58 = arith.constant 0 : index
    %c0_59 = arith.constant 0 : index
    %182 = vector.load %arg8[%c0_58, %c0_59] : memref<32x144xbf16, #tpu.memory_space<vmem>>, vector<32x144xbf16>
    %c0_60 = arith.constant 0 : index
    %c0_61 = arith.constant 0 : index
    %183 = vector.load %arg9[%c0_60, %c0_61] : memref<1x144xf32, #tpu.memory_space<vmem>>, vector<1x144xf32>
    %c0_62 = arith.constant 0 : index
    %c0_63 = arith.constant 0 : index
    %184 = vector.load %arg10[%c0_62, %c0_63] : memref<128x64xbf16, #tpu.memory_space<vmem>>, vector<128x64xbf16>
    %c0_64 = arith.constant 0 : index
    %c0_65 = arith.constant 0 : index
    %185 = vector.load %arg11[%c0_64, %c0_65] : memref<1x64xf32, #tpu.memory_space<vmem>>, vector<1x64xf32>
    %c0_66 = arith.constant 0 : index
    %c0_67 = arith.constant 0 : index
    %186 = vector.load %arg12[%c0_66, %c0_67] : memref<16x6xbf16, #tpu.memory_space<vmem>>, vector<16x6xbf16>
    %187 = arith.truncf %37 : vector<8x32xf32> to vector<8x32xbf16>
    %cst_68 = arith.constant dense<0.000000e+00> : vector<8x144xf32>
    %188 = tpu.matmul %187, %182, %cst_68 {dimension_numbers = #tpu.dot_dimension_numbers<[1], [0], [0], [1], [0, 0, 1, 1], [], []>} : vector<8x32xbf16>, vector<32x144xbf16>, vector<8x144xf32> -> vector<8x144xf32>
    %189 = vector.broadcast %183 : vector<1x144xf32> to vector<8x144xf32>
    %190 = arith.addf %188, %189 : vector<8x144xf32>
    %cst_69 = arith.constant 0.000000e+00 : f32
    %191 = vector.broadcast %cst_69 : f32 to vector<8x144xf32>
    %192 = arith.maximumf %190, %191 : vector<8x144xf32>
    %193 = vector.extract_strided_slice %192 {offsets = [0, 0], sizes = [8, 128], strides = [1, 1]} : vector<8x144xf32> to vector<8x128xf32>
    %194 = vector.extract_strided_slice %192 {offsets = [0, 128], sizes = [8, 16], strides = [1, 1]} : vector<8x144xf32> to vector<8x16xf32>
    %195 = arith.truncf %193 : vector<8x128xf32> to vector<8x128xbf16>
    %cst_70 = arith.constant dense<0.000000e+00> : vector<8x64xf32>
    %196 = tpu.matmul %195, %184, %cst_70 {dimension_numbers = #tpu.dot_dimension_numbers<[1], [0], [0], [1], [0, 0, 1, 1], [], []>} : vector<8x128xbf16>, vector<128x64xbf16>, vector<8x64xf32> -> vector<8x64xf32>
    %197 = vector.broadcast %185 : vector<1x64xf32> to vector<8x64xf32>
    %198 = arith.addf %196, %197 : vector<8x64xf32>
    %cst_71 = arith.constant 0.000000e+00 : f32
    %199 = vector.broadcast %cst_71 : f32 to vector<8x64xf32>
    %200 = arith.maximumf %198, %199 : vector<8x64xf32>
    %201 = arith.truncf %194 : vector<8x16xf32> to vector<8x16xbf16>
    %cst_72 = arith.constant dense<0.000000e+00> : vector<8x6xf32>
    %202 = tpu.matmul %201, %186, %cst_72 {dimension_numbers = #tpu.dot_dimension_numbers<[1], [0], [0], [1], [0, 0, 1, 1], [], []>} : vector<8x16xbf16>, vector<16x6xbf16>, vector<8x6xf32> -> vector<8x6xf32>
    %cst_73 = arith.constant dense<0xFF800000> : vector<8xf32>
    %203 = vector.multi_reduction <maximumf>, %202, %cst_73 [1] : vector<8x6xf32> to vector<8xf32>
    %204 = vector.shape_cast %203 : vector<8xf32> to vector<8x1xf32>
    %205 = vector.broadcast %204 : vector<8x1xf32> to vector<8x6xf32>
    %206 = arith.subf %202, %205 : vector<8x6xf32>
    %207 = math.exp %206 : vector<8x6xf32>
    %cst_74 = arith.constant dense<0.000000e+00> : vector<8xf32>
    %208 = vector.multi_reduction <add>, %207, %cst_74 [1] : vector<8x6xf32> to vector<8xf32>
    %209 = vector.shape_cast %208 : vector<8xf32> to vector<8x1xf32>
    %210 = tpu.reciprocal %209 {approx = true} : vector<8x1xf32> -> vector<8x1xf32>
    %211 = vector.broadcast %210 : vector<8x1xf32> to vector<8x6xf32>
    %212 = arith.mulf %207, %211 : vector<8x6xf32>
    %213 = tpu.concatenate %133, %200 in 1 : vector<8x64xf32>, vector<8x64xf32> -> vector<8x128xf32>
    %cst_75 = arith.constant dense<0.000000e+00> : vector<8x128xf32>
    %214 = tpu.matmul %145, %50, %cst_75 {dimension_numbers = #tpu.dot_dimension_numbers<[1], [0], [0], [1], [0, 0, 1, 1], [], []>} : vector<8x4xf32>, vector<4x128xf32>, vector<8x128xf32> -> vector<8x128xf32>
    %215 = arith.mulf %214, %213 : vector<8x128xf32>
    %cst_76 = arith.constant dense<0.000000e+00> : vector<8x32xf32>
    %216 = tpu.matmul %215, %69, %cst_76 {dimension_numbers = #tpu.dot_dimension_numbers<[1], [0], [0], [1], [0, 0, 1, 1], [], []>} : vector<8x128xf32>, vector<128x32xf32>, vector<8x32xf32> -> vector<8x32xf32>
    %217 = tpu.concatenate %169, %200 in 1 : vector<8x64xf32>, vector<8x64xf32> -> vector<8x128xf32>
    %cst_77 = arith.constant dense<0.000000e+00> : vector<8x128xf32>
    %218 = tpu.matmul %181, %50, %cst_77 {dimension_numbers = #tpu.dot_dimension_numbers<[1], [0], [0], [1], [0, 0, 1, 1], [], []>} : vector<8x4xf32>, vector<4x128xf32>, vector<8x128xf32> -> vector<8x128xf32>
    %219 = arith.mulf %218, %217 : vector<8x128xf32>
    %cst_78 = arith.constant dense<0.000000e+00> : vector<8x32xf32>
    %220 = tpu.matmul %219, %69, %cst_78 {dimension_numbers = #tpu.dot_dimension_numbers<[1], [0], [0], [1], [0, 0, 1, 1], [], []>} : vector<8x128xf32>, vector<128x32xf32>, vector<8x32xf32> -> vector<8x32xf32>
    %221 = tpu.concatenate %133, %169, %200 in 1 : vector<8x64xf32>, vector<8x64xf32>, vector<8x64xf32> -> vector<8x192xf32>
    %cst_79 = arith.constant dense<0.000000e+00> : vector<8x192xf32>
    %222 = tpu.matmul %212, %82, %cst_79 {dimension_numbers = #tpu.dot_dimension_numbers<[1], [0], [0], [1], [0, 0, 1, 1], [], []>} : vector<8x6xf32>, vector<6x192xf32>, vector<8x192xf32> -> vector<8x192xf32>
    %223 = arith.mulf %222, %221 : vector<8x192xf32>
    %cst_80 = arith.constant dense<0.000000e+00> : vector<8x32xf32>
    %224 = tpu.matmul %223, %109, %cst_80 {dimension_numbers = #tpu.dot_dimension_numbers<[1], [0], [0], [1], [0, 0, 1, 1], [], []>} : vector<8x192xf32>, vector<192x32xf32>, vector<8x32xf32> -> vector<8x32xf32>
    %c0_81 = arith.constant 0 : index
    %c0_82 = arith.constant 0 : index
    %c0_83 = arith.constant 0 : index
    %225 = vector.load %arg13[%c0_81, %c0_82, %c0_83] : memref<2x32x144xbf16, #tpu.memory_space<vmem>>, vector<1x32x144xbf16>
    %226 = vector.shape_cast %225 : vector<1x32x144xbf16> to vector<32x144xbf16>
    %c0_84 = arith.constant 0 : index
    %c0_85 = arith.constant 0 : index
    %c0_86 = arith.constant 0 : index
    %227 = vector.load %arg14[%c0_84, %c0_85, %c0_86] : memref<2x1x144xf32, #tpu.memory_space<vmem>>, vector<1x1x144xf32>
    %228 = vector.shape_cast %227 : vector<1x1x144xf32> to vector<1x144xf32>
    %c0_87 = arith.constant 0 : index
    %c0_88 = arith.constant 0 : index
    %c0_89 = arith.constant 0 : index
    %229 = vector.load %arg15[%c0_87, %c0_88, %c0_89] : memref<2x128x64xbf16, #tpu.memory_space<vmem>>, vector<1x128x64xbf16>
    %230 = vector.shape_cast %229 : vector<1x128x64xbf16> to vector<128x64xbf16>
    %c0_90 = arith.constant 0 : index
    %c0_91 = arith.constant 0 : index
    %c0_92 = arith.constant 0 : index
    %231 = vector.load %arg16[%c0_90, %c0_91, %c0_92] : memref<2x1x64xf32, #tpu.memory_space<vmem>>, vector<1x1x64xf32>
    %232 = vector.shape_cast %231 : vector<1x1x64xf32> to vector<1x64xf32>
    %c0_93 = arith.constant 0 : index
    %c0_94 = arith.constant 0 : index
    %c0_95 = arith.constant 0 : index
    %233 = vector.load %arg17[%c0_93, %c0_94, %c0_95] : memref<2x16x4xbf16, #tpu.memory_space<vmem>>, vector<1x16x4xbf16>
    %234 = vector.shape_cast %233 : vector<1x16x4xbf16> to vector<16x4xbf16>
    %235 = arith.truncf %216 : vector<8x32xf32> to vector<8x32xbf16>
    %cst_96 = arith.constant dense<0.000000e+00> : vector<8x144xf32>
    %236 = tpu.matmul %235, %226, %cst_96 {dimension_numbers = #tpu.dot_dimension_numbers<[1], [0], [0], [1], [0, 0, 1, 1], [], []>} : vector<8x32xbf16>, vector<32x144xbf16>, vector<8x144xf32> -> vector<8x144xf32>
    %237 = vector.broadcast %228 : vector<1x144xf32> to vector<8x144xf32>
    %238 = arith.addf %236, %237 : vector<8x144xf32>
    %cst_97 = arith.constant 0.000000e+00 : f32
    %239 = vector.broadcast %cst_97 : f32 to vector<8x144xf32>
    %240 = arith.maximumf %238, %239 : vector<8x144xf32>
    %241 = vector.extract_strided_slice %240 {offsets = [0, 0], sizes = [8, 128], strides = [1, 1]} : vector<8x144xf32> to vector<8x128xf32>
    %242 = vector.extract_strided_slice %240 {offsets = [0, 128], sizes = [8, 16], strides = [1, 1]} : vector<8x144xf32> to vector<8x16xf32>
    %243 = arith.truncf %241 : vector<8x128xf32> to vector<8x128xbf16>
    %cst_98 = arith.constant dense<0.000000e+00> : vector<8x64xf32>
    %244 = tpu.matmul %243, %230, %cst_98 {dimension_numbers = #tpu.dot_dimension_numbers<[1], [0], [0], [1], [0, 0, 1, 1], [], []>} : vector<8x128xbf16>, vector<128x64xbf16>, vector<8x64xf32> -> vector<8x64xf32>
    %245 = vector.broadcast %232 : vector<1x64xf32> to vector<8x64xf32>
    %246 = arith.addf %244, %245 : vector<8x64xf32>
    %cst_99 = arith.constant 0.000000e+00 : f32
    %247 = vector.broadcast %cst_99 : f32 to vector<8x64xf32>
    %248 = arith.maximumf %246, %247 : vector<8x64xf32>
    %249 = arith.truncf %242 : vector<8x16xf32> to vector<8x16xbf16>
    %cst_100 = arith.constant dense<0.000000e+00> : vector<8x4xf32>
    %250 = tpu.matmul %249, %234, %cst_100 {dimension_numbers = #tpu.dot_dimension_numbers<[1], [0], [0], [1], [0, 0, 1, 1], [], []>} : vector<8x16xbf16>, vector<16x4xbf16>, vector<8x4xf32> -> vector<8x4xf32>
    %cst_101 = arith.constant dense<0xFF800000> : vector<8xf32>
    %251 = vector.multi_reduction <maximumf>, %250, %cst_101 [1] : vector<8x4xf32> to vector<8xf32>
    %252 = vector.shape_cast %251 : vector<8xf32> to vector<8x1xf32>
    %253 = vector.broadcast %252 : vector<8x1xf32> to vector<8x4xf32>
    %254 = arith.subf %250, %253 : vector<8x4xf32>
    %255 = math.exp %254 : vector<8x4xf32>
    %cst_102 = arith.constant dense<0.000000e+00> : vector<8xf32>
    %256 = vector.multi_reduction <add>, %255, %cst_102 [1] : vector<8x4xf32> to vector<8xf32>
    %257 = vector.shape_cast %256 : vector<8xf32> to vector<8x1xf32>
    %258 = tpu.reciprocal %257 {approx = true} : vector<8x1xf32> -> vector<8x1xf32>
    %259 = vector.broadcast %258 : vector<8x1xf32> to vector<8x4xf32>
    %260 = arith.mulf %255, %259 : vector<8x4xf32>
    %c1_103 = arith.constant 1 : index
    %c0_104 = arith.constant 0 : index
    %c0_105 = arith.constant 0 : index
    %261 = vector.load %arg13[%c1_103, %c0_104, %c0_105] : memref<2x32x144xbf16, #tpu.memory_space<vmem>>, vector<1x32x144xbf16>
    %262 = vector.shape_cast %261 : vector<1x32x144xbf16> to vector<32x144xbf16>
    %c1_106 = arith.constant 1 : index
    %c0_107 = arith.constant 0 : index
    %c0_108 = arith.constant 0 : index
    %263 = vector.load %arg14[%c1_106, %c0_107, %c0_108] : memref<2x1x144xf32, #tpu.memory_space<vmem>>, vector<1x1x144xf32>
    %264 = vector.shape_cast %263 : vector<1x1x144xf32> to vector<1x144xf32>
    %c1_109 = arith.constant 1 : index
    %c0_110 = arith.constant 0 : index
    %c0_111 = arith.constant 0 : index
    %265 = vector.load %arg15[%c1_109, %c0_110, %c0_111] : memref<2x128x64xbf16, #tpu.memory_space<vmem>>, vector<1x128x64xbf16>
    %266 = vector.shape_cast %265 : vector<1x128x64xbf16> to vector<128x64xbf16>
    %c1_112 = arith.constant 1 : index
    %c0_113 = arith.constant 0 : index
    %c0_114 = arith.constant 0 : index
    %267 = vector.load %arg16[%c1_112, %c0_113, %c0_114] : memref<2x1x64xf32, #tpu.memory_space<vmem>>, vector<1x1x64xf32>
    %268 = vector.shape_cast %267 : vector<1x1x64xf32> to vector<1x64xf32>
    %c1_115 = arith.constant 1 : index
    %c0_116 = arith.constant 0 : index
    %c0_117 = arith.constant 0 : index
    %269 = vector.load %arg17[%c1_115, %c0_116, %c0_117] : memref<2x16x4xbf16, #tpu.memory_space<vmem>>, vector<1x16x4xbf16>
    %270 = vector.shape_cast %269 : vector<1x16x4xbf16> to vector<16x4xbf16>
    %271 = arith.truncf %220 : vector<8x32xf32> to vector<8x32xbf16>
    %cst_118 = arith.constant dense<0.000000e+00> : vector<8x144xf32>
    %272 = tpu.matmul %271, %262, %cst_118 {dimension_numbers = #tpu.dot_dimension_numbers<[1], [0], [0], [1], [0, 0, 1, 1], [], []>} : vector<8x32xbf16>, vector<32x144xbf16>, vector<8x144xf32> -> vector<8x144xf32>
    %273 = vector.broadcast %264 : vector<1x144xf32> to vector<8x144xf32>
    %274 = arith.addf %272, %273 : vector<8x144xf32>
    %cst_119 = arith.constant 0.000000e+00 : f32
    %275 = vector.broadcast %cst_119 : f32 to vector<8x144xf32>
    %276 = arith.maximumf %274, %275 : vector<8x144xf32>
    %277 = vector.extract_strided_slice %276 {offsets = [0, 0], sizes = [8, 128], strides = [1, 1]} : vector<8x144xf32> to vector<8x128xf32>
    %278 = vector.extract_strided_slice %276 {offsets = [0, 128], sizes = [8, 16], strides = [1, 1]} : vector<8x144xf32> to vector<8x16xf32>
    %279 = arith.truncf %277 : vector<8x128xf32> to vector<8x128xbf16>
    %cst_120 = arith.constant dense<0.000000e+00> : vector<8x64xf32>
    %280 = tpu.matmul %279, %266, %cst_120 {dimension_numbers = #tpu.dot_dimension_numbers<[1], [0], [0], [1], [0, 0, 1, 1], [], []>} : vector<8x128xbf16>, vector<128x64xbf16>, vector<8x64xf32> -> vector<8x64xf32>
    %281 = vector.broadcast %268 : vector<1x64xf32> to vector<8x64xf32>
    %282 = arith.addf %280, %281 : vector<8x64xf32>
    %cst_121 = arith.constant 0.000000e+00 : f32
    %283 = vector.broadcast %cst_121 : f32 to vector<8x64xf32>
    %284 = arith.maximumf %282, %283 : vector<8x64xf32>
    %285 = arith.truncf %278 : vector<8x16xf32> to vector<8x16xbf16>
    %cst_122 = arith.constant dense<0.000000e+00> : vector<8x4xf32>
    %286 = tpu.matmul %285, %270, %cst_122 {dimension_numbers = #tpu.dot_dimension_numbers<[1], [0], [0], [1], [0, 0, 1, 1], [], []>} : vector<8x16xbf16>, vector<16x4xbf16>, vector<8x4xf32> -> vector<8x4xf32>
    %cst_123 = arith.constant dense<0xFF800000> : vector<8xf32>
    %287 = vector.multi_reduction <maximumf>, %286, %cst_123 [1] : vector<8x4xf32> to vector<8xf32>
    %288 = vector.shape_cast %287 : vector<8xf32> to vector<8x1xf32>
    %289 = vector.broadcast %288 : vector<8x1xf32> to vector<8x4xf32>
    %290 = arith.subf %286, %289 : vector<8x4xf32>
    %291 = math.exp %290 : vector<8x4xf32>
    %cst_124 = arith.constant dense<0.000000e+00> : vector<8xf32>
    %292 = vector.multi_reduction <add>, %291, %cst_124 [1] : vector<8x4xf32> to vector<8xf32>
    %293 = vector.shape_cast %292 : vector<8xf32> to vector<8x1xf32>
    %294 = tpu.reciprocal %293 {approx = true} : vector<8x1xf32> -> vector<8x1xf32>
    %295 = vector.broadcast %294 : vector<8x1xf32> to vector<8x4xf32>
    %296 = arith.mulf %291, %295 : vector<8x4xf32>
    %c0_125 = arith.constant 0 : index
    %c0_126 = arith.constant 0 : index
    %297 = vector.load %arg18[%c0_125, %c0_126] : memref<32x144xbf16, #tpu.memory_space<vmem>>, vector<32x144xbf16>
    %c0_127 = arith.constant 0 : index
    %c0_128 = arith.constant 0 : index
    %298 = vector.load %arg19[%c0_127, %c0_128] : memref<1x144xf32, #tpu.memory_space<vmem>>, vector<1x144xf32>
    %c0_129 = arith.constant 0 : index
    %c0_130 = arith.constant 0 : index
    %299 = vector.load %arg20[%c0_129, %c0_130] : memref<128x64xbf16, #tpu.memory_space<vmem>>, vector<128x64xbf16>
    %c0_131 = arith.constant 0 : index
    %c0_132 = arith.constant 0 : index
    %300 = vector.load %arg21[%c0_131, %c0_132] : memref<1x64xf32, #tpu.memory_space<vmem>>, vector<1x64xf32>
    %301 = arith.truncf %224 : vector<8x32xf32> to vector<8x32xbf16>
    %cst_133 = arith.constant dense<0.000000e+00> : vector<8x144xf32>
    %302 = tpu.matmul %301, %297, %cst_133 {dimension_numbers = #tpu.dot_dimension_numbers<[1], [0], [0], [1], [0, 0, 1, 1], [], []>} : vector<8x32xbf16>, vector<32x144xbf16>, vector<8x144xf32> -> vector<8x144xf32>
    %303 = vector.broadcast %298 : vector<1x144xf32> to vector<8x144xf32>
    %304 = arith.addf %302, %303 : vector<8x144xf32>
    %cst_134 = arith.constant 0.000000e+00 : f32
    %305 = vector.broadcast %cst_134 : f32 to vector<8x144xf32>
    %306 = arith.maximumf %304, %305 : vector<8x144xf32>
    %307 = vector.extract_strided_slice %306 {offsets = [0, 0], sizes = [8, 128], strides = [1, 1]} : vector<8x144xf32> to vector<8x128xf32>
    %308 = arith.truncf %307 : vector<8x128xf32> to vector<8x128xbf16>
    %cst_135 = arith.constant dense<0.000000e+00> : vector<8x64xf32>
    %309 = tpu.matmul %308, %299, %cst_135 {dimension_numbers = #tpu.dot_dimension_numbers<[1], [0], [0], [1], [0, 0, 1, 1], [], []>} : vector<8x128xbf16>, vector<128x64xbf16>, vector<8x64xf32> -> vector<8x64xf32>
    %310 = vector.broadcast %300 : vector<1x64xf32> to vector<8x64xf32>
    %311 = arith.addf %309, %310 : vector<8x64xf32>
    %cst_136 = arith.constant 0.000000e+00 : f32
    %312 = vector.broadcast %cst_136 : f32 to vector<8x64xf32>
    %313 = arith.maximumf %311, %312 : vector<8x64xf32>
    %314 = tpu.concatenate %248, %313 in 1 : vector<8x64xf32>, vector<8x64xf32> -> vector<8x128xf32>
    %cst_137 = arith.constant dense<0.000000e+00> : vector<8x128xf32>
    %315 = tpu.matmul %260, %50, %cst_137 {dimension_numbers = #tpu.dot_dimension_numbers<[1], [0], [0], [1], [0, 0, 1, 1], [], []>} : vector<8x4xf32>, vector<4x128xf32>, vector<8x128xf32> -> vector<8x128xf32>
    %316 = arith.mulf %315, %314 : vector<8x128xf32>
    %cst_138 = arith.constant dense<0.000000e+00> : vector<8x32xf32>
    %317 = tpu.matmul %316, %69, %cst_138 {dimension_numbers = #tpu.dot_dimension_numbers<[1], [0], [0], [1], [0, 0, 1, 1], [], []>} : vector<8x128xf32>, vector<128x32xf32>, vector<8x32xf32> -> vector<8x32xf32>
    %318 = tpu.concatenate %284, %313 in 1 : vector<8x64xf32>, vector<8x64xf32> -> vector<8x128xf32>
    %cst_139 = arith.constant dense<0.000000e+00> : vector<8x128xf32>
    %319 = tpu.matmul %296, %50, %cst_139 {dimension_numbers = #tpu.dot_dimension_numbers<[1], [0], [0], [1], [0, 0, 1, 1], [], []>} : vector<8x4xf32>, vector<4x128xf32>, vector<8x128xf32> -> vector<8x128xf32>
    %320 = arith.mulf %319, %318 : vector<8x128xf32>
    %cst_140 = arith.constant dense<0.000000e+00> : vector<8x32xf32>
    %321 = tpu.matmul %320, %69, %cst_140 {dimension_numbers = #tpu.dot_dimension_numbers<[1], [0], [0], [1], [0, 0, 1, 1], [], []>} : vector<8x128xf32>, vector<128x32xf32>, vector<8x32xf32> -> vector<8x32xf32>
    %322 = tpu.concatenate %317, %321 in 1 : vector<8x32xf32>, vector<8x32xf32> -> vector<8x64xf32>
    %c0_141 = arith.constant 0 : index
    %c0_142 = arith.constant 0 : index
    %323 = vector.load %arg23[%c0_141, %c0_142] : memref<64x32xbf16, #tpu.memory_space<vmem>>, vector<64x32xbf16>
    %324 = arith.truncf %322 : vector<8x64xf32> to vector<8x64xbf16>
    %cst_143 = arith.constant dense<0.000000e+00> : vector<8x32xf32>
    %325 = tpu.matmul %324, %323, %cst_143 {dimension_numbers = #tpu.dot_dimension_numbers<[1], [0], [0], [1], [0, 0, 1, 1], [], []>} : vector<8x64xbf16>, vector<64x32xbf16>, vector<8x32xf32> -> vector<8x32xf32>
    %c0_144 = arith.constant 0 : index
    %c0_145 = arith.constant 0 : index
    %326 = vector.load %arg24[%c0_144, %c0_145] : memref<1x32xf32, #tpu.memory_space<vmem>>, vector<1x32xf32>
    %327 = vector.broadcast %326 : vector<1x32xf32> to vector<8x32xf32>
    %328 = arith.addf %325, %327 : vector<8x32xf32>
    %cst_146 = arith.constant 0.000000e+00 : f32
    %329 = vector.broadcast %cst_146 : f32 to vector<8x32xf32>
    %330 = arith.maximumf %328, %329 : vector<8x32xf32>
    %c0_147 = arith.constant 0 : index
    %c0_148 = arith.constant 0 : index
    %331 = vector.load %arg25[%c0_147, %c0_148] : memref<32x2xbf16, #tpu.memory_space<vmem>>, vector<32x2xbf16>
    %332 = arith.truncf %330 : vector<8x32xf32> to vector<8x32xbf16>
    %cst_149 = arith.constant dense<0.000000e+00> : vector<8x2xf32>
    %333 = tpu.matmul %332, %331, %cst_149 {dimension_numbers = #tpu.dot_dimension_numbers<[1], [0], [0], [1], [0, 0, 1, 1], [], []>} : vector<8x32xbf16>, vector<32x2xbf16>, vector<8x2xf32> -> vector<8x2xf32>
    %cst_150 = arith.constant 0.000000e+00 : f32
    %334 = vector.broadcast %cst_150 : f32 to vector<8x2xf32>
    %335 = arith.subf %334, %333 : vector<8x2xf32>
    %336 = math.exp %335 : vector<8x2xf32>
    %cst_151 = arith.constant 1.000000e+00 : f32
    %337 = vector.broadcast %cst_151 : f32 to vector<8x2xf32>
    %338 = arith.addf %337, %336 : vector<8x2xf32>
    %cst_152 = arith.constant 1.000000e+00 : f32
    %339 = vector.broadcast %cst_152 : f32 to vector<8x2xf32>
    %340 = arith.divf %339, %338 : vector<8x2xf32>
    %c0_153 = arith.constant 0 : index
    %c0_154 = arith.constant 0 : index
    %341 = vector.load %arg26[%c0_153, %c0_154] : memref<8x2xf32, #tpu.memory_space<vmem>>, vector<8x2xf32>
    tpu.vector_store %arg26[%c0_153, %c0_154], %340 {strides = array<i32>} : memref<8x2xf32, #tpu.memory_space<vmem>>, vector<8x2xf32>,
    return
  }
  func.func @transform_0(%arg0: i32) -> (i32, i32) {
    %c0_i32 = arith.constant 0 : i32
    %c0_i32_0 = arith.constant 0 : i32
    return %arg0, %c0_i32 : i32, i32
  }
  func.func @transform_1(%arg0: i32) -> (i32, i32) {
    %c0_i32 = arith.constant 0 : i32
    %c0_i32_0 = arith.constant 0 : i32
    %c0_i32_1 = arith.constant 0 : i32
    return %c0_i32, %c0_i32_0 : i32, i32
  }
  func.func @transform_2(%arg0: i32) -> (i32, i32, i32) {
    %c0_i32 = arith.constant 0 : i32
    %c0_i32_0 = arith.constant 0 : i32
    %c0_i32_1 = arith.constant 0 : i32
    %c0_i32_2 = arith.constant 0 : i32
    return %c0_i32, %c0_i32_0, %c0_i32_1 : i32, i32, i32
  }
  func.func @transform_3(%arg0: i32) -> (i32, i32, i32) {
    %c0_i32 = arith.constant 0 : i32
    %c0_i32_0 = arith.constant 0 : i32
    %c0_i32_1 = arith.constant 0 : i32
    %c0_i32_2 = arith.constant 0 : i32
    return %c0_i32, %c0_i32_0, %c0_i32_1 : i32, i32, i32
  }
  func.func @transform_4(%arg0: i32) -> (i32, i32, i32) {
    %c0_i32 = arith.constant 0 : i32
    %c0_i32_0 = arith.constant 0 : i32
    %c0_i32_1 = arith.constant 0 : i32
    %c0_i32_2 = arith.constant 0 : i32
    return %c0_i32, %c0_i32_0, %c0_i32_1 : i32, i32, i32
  }
  func.func @transform_5(%arg0: i32) -> (i32, i32, i32) {
    %c0_i32 = arith.constant 0 : i32
    %c0_i32_0 = arith.constant 0 : i32
    %c0_i32_1 = arith.constant 0 : i32
    %c0_i32_2 = arith.constant 0 : i32
    return %c0_i32, %c0_i32_0, %c0_i32_1 : i32, i32, i32
  }
  func.func @transform_6(%arg0: i32) -> (i32, i32, i32) {
    %c0_i32 = arith.constant 0 : i32
    %c0_i32_0 = arith.constant 0 : i32
    %c0_i32_1 = arith.constant 0 : i32
    %c0_i32_2 = arith.constant 0 : i32
    return %c0_i32, %c0_i32_0, %c0_i32_1 : i32, i32, i32
  }
  func.func @transform_7(%arg0: i32) -> (i32, i32) {
    %c0_i32 = arith.constant 0 : i32
    %c0_i32_0 = arith.constant 0 : i32
    %c0_i32_1 = arith.constant 0 : i32
    return %c0_i32, %c0_i32_0 : i32, i32
  }
  func.func @transform_8(%arg0: i32) -> (i32, i32) {
    %c0_i32 = arith.constant 0 : i32
    %c0_i32_0 = arith.constant 0 : i32
    %c0_i32_1 = arith.constant 0 : i32
    return %c0_i32, %c0_i32_0 : i32, i32
  }
  func.func @transform_9(%arg0: i32) -> (i32, i32) {
    %c0_i32 = arith.constant 0 : i32
    %c0_i32_0 = arith.constant 0 : i32
    %c0_i32_1 = arith.constant 0 : i32
    return %c0_i32, %c0_i32_0 : i32, i32
  }
  func.func @transform_10(%arg0: i32) -> (i32, i32) {
    %c0_i32 = arith.constant 0 : i32
    %c0_i32_0 = arith.constant 0 : i32
    %c0_i32_1 = arith.constant 0 : i32
    return %c0_i32, %c0_i32_0 : i32, i32
  }
  func.func @transform_11(%arg0: i32) -> (i32, i32) {
    %c0_i32 = arith.constant 0 : i32
    %c0_i32_0 = arith.constant 0 : i32
    %c0_i32_1 = arith.constant 0 : i32
    return %c0_i32, %c0_i32_0 : i32, i32
  }
  func.func @transform_12(%arg0: i32) -> (i32, i32, i32) {
    %c0_i32 = arith.constant 0 : i32
    %c0_i32_0 = arith.constant 0 : i32
    %c0_i32_1 = arith.constant 0 : i32
    %c0_i32_2 = arith.constant 0 : i32
    return %c0_i32, %c0_i32_0, %c0_i32_1 : i32, i32, i32
  }
  func.func @transform_13(%arg0: i32) -> (i32, i32, i32) {
    %c0_i32 = arith.constant 0 : i32
    %c0_i32_0 = arith.constant 0 : i32
    %c0_i32_1 = arith.constant 0 : i32
    %c0_i32_2 = arith.constant 0 : i32
    return %c0_i32, %c0_i32_0, %c0_i32_1 : i32, i32, i32
  }
  func.func @transform_14(%arg0: i32) -> (i32, i32, i32) {
    %c0_i32 = arith.constant 0 : i32
    %c0_i32_0 = arith.constant 0 : i32
    %c0_i32_1 = arith.constant 0 : i32
    %c0_i32_2 = arith.constant 0 : i32
    return %c0_i32, %c0_i32_0, %c0_i32_1 : i32, i32, i32
  }
  func.func @transform_15(%arg0: i32) -> (i32, i32, i32) {
    %c0_i32 = arith.constant 0 : i32
    %c0_i32_0 = arith.constant 0 : i32
    %c0_i32_1 = arith.constant 0 : i32
    %c0_i32_2 = arith.constant 0 : i32
    return %c0_i32, %c0_i32_0, %c0_i32_1 : i32, i32, i32
  }
  func.func @transform_16(%arg0: i32) -> (i32, i32, i32) {
    %c0_i32 = arith.constant 0 : i32
    %c0_i32_0 = arith.constant 0 : i32
    %c0_i32_1 = arith.constant 0 : i32
    %c0_i32_2 = arith.constant 0 : i32
    return %c0_i32, %c0_i32_0, %c0_i32_1 : i32, i32, i32
  }
  func.func @transform_17(%arg0: i32) -> (i32, i32) {
    %c0_i32 = arith.constant 0 : i32
    %c0_i32_0 = arith.constant 0 : i32
    %c0_i32_1 = arith.constant 0 : i32
    return %c0_i32, %c0_i32_0 : i32, i32
  }
  func.func @transform_18(%arg0: i32) -> (i32, i32) {
    %c0_i32 = arith.constant 0 : i32
    %c0_i32_0 = arith.constant 0 : i32
    %c0_i32_1 = arith.constant 0 : i32
    return %c0_i32, %c0_i32_0 : i32, i32
  }
  func.func @transform_19(%arg0: i32) -> (i32, i32) {
    %c0_i32 = arith.constant 0 : i32
    %c0_i32_0 = arith.constant 0 : i32
    %c0_i32_1 = arith.constant 0 : i32
    return %c0_i32, %c0_i32_0 : i32, i32
  }
  func.func @transform_20(%arg0: i32) -> (i32, i32) {
    %c0_i32 = arith.constant 0 : i32
    %c0_i32_0 = arith.constant 0 : i32
    %c0_i32_1 = arith.constant 0 : i32
    return %c0_i32, %c0_i32_0 : i32, i32
  }
  func.func @transform_21(%arg0: i32) -> (i32, i32) {
    %c0_i32 = arith.constant 0 : i32
    %c0_i32_0 = arith.constant 0 : i32
    %c0_i32_1 = arith.constant 0 : i32
    return %c0_i32, %c0_i32_0 : i32, i32
  }
  func.func @transform_22(%arg0: i32) -> (i32, i32) {
    %c0_i32 = arith.constant 0 : i32
    %c0_i32_0 = arith.constant 0 : i32
    %c0_i32_1 = arith.constant 0 : i32
    return %c0_i32, %c0_i32_0 : i32, i32
  }
  func.func @transform_23(%arg0: i32) -> (i32, i32) {
    %c0_i32 = arith.constant 0 : i32
    %c0_i32_0 = arith.constant 0 : i32
    %c0_i32_1 = arith.constant 0 : i32
    return %c0_i32, %c0_i32_0 : i32, i32
  }
  func.func @transform_24(%arg0: i32) -> (i32, i32) {
    %c0_i32 = arith.constant 0 : i32
    %c0_i32_0 = arith.constant 0 : i32
    %c0_i32_1 = arith.constant 0 : i32
    return %c0_i32, %c0_i32_0 : i32, i32
  }
  func.func @transform_25(%arg0: i32) -> (i32, i32) {
    %c0_i32 = arith.constant 0 : i32
    %c0_i32_0 = arith.constant 0 : i32
    return %arg0, %c0_i32 : i32, i32
  }
}

</mosaic_0001>

<bundles_post_ra>
// kernel: ple_forward.1
= control target key start
LH: loop header
LB: loop body
LE: loop exit
PB: predicated region body
PF: predicated region fallthrough
CT: control target
= control target key end

     0   :  { %v3963_v0 = vmov 0   ;;  %v3964_v2 = vmov 2   ;;  %v3965_v4 = vmov 0.0   ;;  %v3966_v9 = vmov 1   ;;  %s5185_s0 = inlined_call_operand.vmem [shape: s32[8,4], index: 0, kind: input, shape index: {}]   ;;  %s5186_s21 = inlined_call_operand.vmem [shape: bf16[16,6], index: 21, kind: input, shape index: {}]   ;;  %s5187_s1 = inlined_call_operand.vmem [shape: bf16[128,32], index: 1, kind: input, shape index: {}]   ;;  %s5188_s2 = inlined_call_operand.vmem [shape: bf16[2,32,144], index: 2, kind: input, shape index: {}]   ;;  %s5189_s4 = inlined_call_operand.vmem [shape: bf16[2,128,64], index: 4, kind: input, shape index: {}]   ;;  %s5190_s6 = inlined_call_operand.vmem [shape: bf16[2,16,4], index: 6, kind: input, shape index: {}]   ;;  %s5191_s3 = inlined_call_operand.vmem [shape: f32[2,1,144], index: 3, kind: input, shape index: {}]   ;;  %s5192_s7 = inlined_call_operand.vmem [shape: bf16[32,144], index: 7, kind: input, shape index: {}]   ;;  %s5193_s9 = inlined_call_operand.vmem [shape: bf16[128,64], index: 9, kind: input, shape index: {}]   ;;  %s5194_s11 = inlined_call_operand.vmem [shape: bf16[16,6], index: 11, kind: input, shape index: {}]   ;;  %s5195_s8 = inlined_call_operand.vmem [shape: f32[1,144], index: 8, kind: input, shape index: {}]   ;;  %s5196_s10 = inlined_call_operand.vmem [shape: f32[1,64], index: 10, kind: input, shape index: {}]   ;;  %s5197_s5 = inlined_call_operand.vmem [shape: f32[2,1,64], index: 5, kind: input, shape index: {}]   ;;  %s5198_s12 = inlined_call_operand.vmem [shape: bf16[2,32,144], index: 12, kind: input, shape index: {}]   ;;  %s5199_s14 = inlined_call_operand.vmem [shape: bf16[2,128,64], index: 14, kind: input, shape index: {}]   ;;  %s5200_s16 = inlined_call_operand.vmem [shape: bf16[2,16,4], index: 16, kind: input, shape index: {}]   ;;  %s5201_s13 = inlined_call_operand.vmem [shape: f32[2,1,144], index: 13, kind: input, shape index: {}]   ;;  %s5202_s17 = inlined_call_operand.vmem [shape: bf16[32,144], index: 17, kind: input, shape index: {}]   ;;  %s5203_s19 = inlined_call_operand.vmem [shape: bf16[128,64], index: 19, kind: input, shape index: {}]   ;;  %s5204_s18 = inlined_call_operand.vmem [shape: f32[1,144], index: 18, kind: input, shape index: {}]   ;;  %s5205_s20 = inlined_call_operand.vmem [shape: f32[1,64], index: 20, kind: input, shape index: {}]   ;;  %s5206_s15 = inlined_call_operand.vmem [shape: f32[2,1,64], index: 15, kind: input, shape index: {}]   ;;  %s5207_s22 = inlined_call_operand.vmem [shape: bf16[64,32], index: 22, kind: input, shape index: {}]   ;;  %s5208_s24 = inlined_call_operand.vmem [shape: bf16[32,2], index: 24, kind: input, shape index: {}]   ;;  %s5209_s23 = inlined_call_operand.vmem [shape: f32[1,32], index: 23, kind: input, shape index: {}]   ;;  %s5210_s25 = inlined_call_operand.vmem [shape: f32[8,2], index: 25, kind: output, shape index: {}]  }
   0x1   :  { %5255 = sst [smem:[#allocation2_spill]] %s5185_s0  ;;  %3831 = vset.pattern.permute.xlu0 %v3963_v0  ;;  %3833 = vset.pattern.permute.xlu1 %v3964_v2  ;;  %v3967_v10 = vmov 3   ;;  %vm5221_vm0 = vmmov 0   ;;  %v82_v20 = vlaneseq  ;;  %vm5220_vm5 = vcmask 261120  }
   0x2   :  { %5256 = sst [smem:[#allocation3_spill]] %s5187_s1  ;;  %3472 = vmatprep.subr.bf16.mxu0 %v3965_v4  ;;  %698 = vmatprep.mubr.bf16.mxu1 %v3963_v0  ;;  %vm5219_vm6 = vcmask 130048   ;;  %vm5223_vm7 = vcmask 31744   ;;  %vm5218_vm11 = vcmask 1043456  }
   0x3   :  { %5257 = sst [smem:[#allocation4_spill]] %s5188_s2  ;;  %3488 = vmatprep.mubr.msk.bf16.mxu0 %vm5221_vm0, %v3965_v4  ;;  %v4151_v21 = vand.u32 127, %v82_v20  ;;  %v4211_v50 = vshrl.u32 %v82_v20, 7 }
   0x4   :  { %5258 = sst [smem:[#allocation5_spill]] %s5189_s4 }
   0x5   :  { %5259 = sst [smem:[#allocation6_spill]] %s5190_s6  ;;  %v4214_v51 = vsub.s32 0, %v4211_v50  ;;  %v4220_v53 = vsub.s32 1, %v4211_v50 }
   0x6   :  { %5260 = sst [smem:[#allocation7_spill]] %s5191_s3 }
   0x7   :  { %5261 = sst [smem:[#allocation8_spill]] %s5192_s7 }
   0x8   :  { %5262 = sst [smem:[#allocation9_spill]] %s5193_s9 }
   0x9   :  { %5263 = sst [smem:[#allocation10_spill]] %s5194_s11 }
   0xa   :  { %s5264_s3 = sld [smem:[#allocation2_spill]] }
   0xb   :  { %s5265_s2 = sld [smem:[#allocation3_spill]] }
   0xc   :  { %s5266_s1 = sld [smem:[#allocation4_spill]] }
   0xd   :  { %s5268_s4 = sld [smem:[#allocation6_spill]] }
   0xe   :  { %s5269_s28 = sld [smem:[#allocation7_spill]] }
   0xf   :  { %s5271_s21 = sld [smem:[#allocation9_spill]] }
  0x10   :  { %v81_v1 = vld [vmem:[%s5264_s3] sm:$0xff]  ;;  %s5267_s3 = sld [smem:[#allocation5_spill]] }
  0x11   :  { %85 = vperm.xlu0 %3831, %v81_v1   ;;  %v99_v3 = vadd.s32 30, %v81_v1  ;;  %v3836_v5 = vld [vmem:[%s5265_s2 + $0x38] sm:$0xff]   ;;  %v91_v6 = vadd.s32 10, %v81_v1  ;;  %v3837_v7 = vld [vmem:[%s5265_s2 + $0x30] sm:$0xff]   ;;  %v107_v8 = vadd.s32 60, %v81_v1  ;;  %v3838_v11 = vld [vmem:[%s5265_s2 + $0x28] sm:$0xff]  }
  0x12   :  { %3473 = vmatpush3.bf16.msra.mxu0 %v3836_v5  ;;  %v3839_v12 = vld [vmem:[%s5265_s2 + $0x20] sm:$0xff]   ;;  %v3840_v13 = vld [vmem:[%s5265_s2 + $0x18] sm:$0xff]   ;;  %v3841_v17 = vld [vmem:[%s5265_s2 + $0x10] sm:$0xff]   ;;  %s5272_s0 = sld [smem:[#allocation10_spill]] }
  0x13   :  { %101 = vperm.xlu1 %3833, %v99_v3   ;;  %3474 = vmatprep.subr.bf16.mxu0 %v3965_v4  ;;  %v3844_v14 = vld [vmem:[%s5266_s1 + $0x14] ss:$8 sps:$4 sm:$0xff]   ;;  %v3846_v15 = vld [vmem:[%s5266_s1 + $0x10] ss:$8 sps:$4 sm:$0xff]   ;;  %v3847_v16 = vld [vmem:[%s5266_s1 + $0x4] ss:$8 sps:$4 sm:$0xff]  }
  0x14   :  { %678 = vmatprep.subr.bf16.mxu1 %v3844_v14  ;;  %v3842_v18 = vld [vmem:[%s5265_s2 + $0x8] sm:$0xff]   ;;  %v3843_v19 = vld [vmem:[%s5265_s2] sm:$0xff]   ;;  %v3861_v49 = vld [vmem:[%s5266_s1 + $0x34] ss:$8 sps:$4 sm:$0xff]  }
  0x15   :  { %3832 = vset.pattern.permute.xlu0 %v3966_v9  ;;  %679 = vmatpush1.bf16.msra.mxu1 %v3846_v15  ;;  %v3849_v34 = vld [vmem:[%s5266_s1] ss:$8 sps:$4 sm:$0xff]   ;;  %v3859_v3 = vld [vmem:[%s5266_s1 + $0x30] ss:$8 sps:$4 sm:$0xff]  }
  0x16   :  { %93 = vperm.xlu0 %3832, %v91_v6   ;;  %3475 = vmatpush3.bf16.msra.mxu0 %v3837_v7  ;;  %v3850_v36 = vld [vmem:[%s5267_s3 + $0x38] sm:$0xff]   ;;  %v3851_v40 = vld [vmem:[%s5267_s3 + $0x30] sm:$0xff]   ;;  %v3852_v42 = vld [vmem:[%s5267_s3 + $0x28] sm:$0xff]  }
  0x17   :  { %3834 = vset.pattern.permute.xlu1 %v3967_v10  ;;  %3476 = vmatprep.subr.bf16.mxu0 %v3965_v4  ;;  %v3853_v43 = vld [vmem:[%s5267_s3 + $0x20] sm:$0xff]   ;;  %v3854_v44 = vld [vmem:[%s5267_s3 + $0x18] sm:$0xff]   ;;  %v3855_v45 = vld [vmem:[%s5267_s3 + $0x10] sm:$0xff]  }
  0x18   :  { %109 = vperm.xlu1 %3834, %v107_v8   ;;  %680 = vmatprep.subr.bf16.mxu1 %v3847_v16  ;;  %v3856_v46 = vld [vmem:[%s5267_s3 + $0x8] sm:$0xff]   ;;  %v3858_v47 = vld [vmem:[%s5267_s3] sm:$0xff]   ;;  %v3865_v62 = vld [vmem:[%s5267_s3 + $0x78] sm:$0xff]  }
  0x19   :  { %681 = vmatpush1.bf16.msra.mxu1 %v3849_v34  ;;  %v3857_v48 = vld [vmem:[%s5268_s4] sm:$0xff]   ;;  %v3866_v7 = vld [vmem:[%s5267_s3 + $0x70] sm:$0xff]   ;;  %v3867_v9 = vld [vmem:[%s5267_s3 + $0x68] sm:$0xff]  }
  0x1a   :  { %3835 = vset.pattern.permute.xlu0 %v3967_v10  ;;  %3477 = vmatpush3.bf16.msra.mxu0 %v3838_v11  ;;  %v610_v52 = vld [vmem:[%s5269_s28] sm:$0x3]  ;;  %v3864_v6 = vld [vmem:[%s5266_s1 + $0x24] ss:$8 sps:$4 sm:$0xff]   ;;  %v3869_v11 = vld [vmem:[%s5267_s3 + $0x58] sm:$0xff]  }
  0x1b   :  { %3478 = vmatprep.subr.bf16.mxu0 %v3965_v4  ;;  %3492 = vmatprep.subr.bf16.mxu1 %v3965_v4  ;;  %v635_v54 = vrot.slane %v610_v52, %v4214_v51  ;;  %v639_v55 = vrot.slane %v610_v52, %v4220_v53  ;;  %v3862_v8 = vld [vmem:[%s5266_s1 + $0x20] ss:$8 sps:$4 sm:$0xff]   ;;  %s5270_s1 = sld [smem:[#allocation8_spill]] }
  0x1c   :  { %v3868_v10 = vld [vmem:[%s5267_s3 + $0x60] sm:$0xff]   ;;  %v3872_v15 = vld [vmem:[%s5268_s4 + $0x8] sm:$0xff]   ;;  %s3970_s4 = smov 64  }
  0x1d   :  { %v3873_v14 = vld [vmem:[%s5267_s3 + $0x40] sm:$0xff]  }
  0x1e   :  { %3479 = vmatpush3.bf16.msra.mxu0 %v3839_v12  ;;  %v3870_v12 = vld [vmem:[%s5267_s3 + $0x50] sm:$0xff]   ;;  %v3887_v52 = vld [vmem:[%s5271_s21] sm:$0xff]  }
  0x1f   :  { %3480 = vmatprep.subr.bf16.mxu0 %v3965_v4 }
  0x21   :  { %v3876_v16 = vld [vmem:[%s5270_s1 + $0x14] ss:$8 sps:$4 sm:$0xff]  }
  0x22   :  { %3481 = vmatpush3.bf16.msra.mxu0 %v3840_v13  ;;  %v3871_v13 = vld [vmem:[%s5267_s3 + $0x48] sm:$0xff]   ;;  %s3971_s3 = smov 32  }
  0x23   :  { %3482 = vmatprep.subr.bf16.mxu0 %v3965_v4 }
  0x26   :  { %3483 = vmatpush3.bf16.msra.mxu0 %v3841_v17 }
  0x27   :  { %3484 = vmatprep.subr.bf16.mxu0 %v3965_v4 }
  0x2a   :  { %3485 = vmatpush3.bf16.msra.mxu0 %v3842_v18 }
  0x2b   :  { %3486 = vmatprep.subr.bf16.mxu0 %v3965_v4 }
  0x2e   :  { %3487 = vmatpush3.bf16.msra.mxu0 %v3843_v19 }
  0x2f   :  { %3512 = vmatprep.subr.bf16.mxu0 %v3965_v4 }
  0x8c   :  { %v86_v22 = vpop.permute.xlu0 %85 }
  0x8d   :  { %vm87_vm1 = vcmp.eq.s32.totalorder %v4151_v21, %v86_v22 }
  0x8e   :  { %v102_v23 = vpop.permute.xlu1 %101  ;;  %v3010_v25 = vsel %vm87_vm1, 1.0, %v3965_v4 }
  0x8f   :  { %vm103_vm2 = vcmp.eq.s32.totalorder %v4151_v21, %v102_v23 }
  0x90   :  { %v3012_v29 = vsel %vm103_vm2, 1.0, %v3965_v4 }
  0x91   :  { %v94_v24 = vpop.permute.xlu0 %93 }
  0x92   :  { %vm95_vm3 = vcmp.eq.s32.totalorder %v4151_v21, %v94_v24  ;;  %v3084_v24 = vld [vmem:[%s5269_s28 + $0x2] sm:$0x3] }
  0x93   :  { %v3011_v26 = vsel %vm95_vm3, 1.0, %v3965_v4  ;;  %v110_v27 = vpop.permute.xlu1 %109 }
  0x94   :  { %v98_v28 = vadd.f32 %v3011_v26, %v3010_v25  ;;  %vm111_vm4 = vcmp.eq.s32.totalorder %v4151_v21, %v110_v27  ;;  %v901_v27 = vrot.slane %v3084_v24, %v4214_v51 }
  0x95   :  { %v3013_v30 = vsel %vm111_vm4, 1.0, %v3965_v4 }
  0x96   :  { %v106_v31 = vadd.f32 %v3012_v29, %v98_v28  ;;  %v905_v29 = vrot.slane %v3084_v24, %v4220_v53 }
  0x98   :  { %v114_v32 = vadd.f32 %v3013_v30, %v106_v31 }
  0x9a   :  { %v131_v33 = vpack.c.bf16 %v114_v32, %v114_v32 }
  0x9c   :  { %3489 = vmatmul.mubr.bf16.vlgmr.msra.gmra.mxu0 %v131_v33 }
  0x9d   :  { %3514 = vmatprep.mubr.msk.bf16.mxu0 %vm5221_vm0, %v3965_v4  ;;  %3513 = vmatpush3.bf16.msra.mxu0 %v3857_v48  ;;  %v3885_v48 = vld [vmem:[%s5271_s21 + $0x10] sm:$0xff]  }
  0x9e   :  { %940 = vmatprep.subr.bf16.mxu0 %v3861_v49  ;;  %v3886_v49 = vld [vmem:[%s5271_s21 + $0x8] sm:$0xff]  }
 0x15c   :  { %v214_v35 = vpop.f32.mrf.mxu0 }
 0x15d   :  { %v4170_v37 = vpack.c.bf16 %v214_v35, %v214_v35 }
 0x15e   :  { %v3490_v38 = vpop.f32.mrf.mxu0 }
 0x15f   :  { %3068 = vmatmul.mubr.msk.bf16.vlgmr.msra.gmra.mxu1 %vm5220_vm5, %v4170_v37 }
 0x160   :  { %v217_v39 = vpop.f32.mrf.mxu0  ;;  %3493 = vmatpush3.bf16.msra.mxu1 %v3850_v36  ;;  %3508 = vmatprep.mubr.msk.bf16.mxu1 %vm5221_vm0, %v3965_v4 }
 0x161   :  { %3494 = vmatprep.subr.bf16.mxu1 %v3965_v4 }
 0x162   :  { %v3491_v41 = vpop.f32.mrf.mxu0 }
 0x164   :  { %3495 = vmatpush3.bf16.msra.mxu1 %v3851_v40  ;;  %v3874_v40 = vld [vmem:[%s5270_s1 + $0x10] ss:$8 sps:$4 sm:$0xff]  }
 0x165   :  { %3496 = vmatprep.subr.bf16.mxu1 %v3965_v4 }
 0x168   :  { %3497 = vmatpush3.bf16.msra.mxu1 %v3852_v42  ;;  %v3879_v42 = vld [vmem:[%s5270_s1 + $0x4] ss:$8 sps:$4 sm:$0xff]  }
 0x169   :  { %3498 = vmatprep.subr.bf16.mxu1 %v3965_v4 }
 0x16c   :  { %3499 = vmatpush3.bf16.msra.mxu1 %v3853_v43  ;;  %v3877_v43 = vld [vmem:[%s5270_s1] ss:$8 sps:$4 sm:$0xff]  }
 0x16d   :  { %3500 = vmatprep.subr.bf16.mxu1 %v3965_v4 }
 0x170   :  { %3501 = vmatpush3.bf16.msra.mxu1 %v3854_v44  ;;  %v3880_v44 = vld [vmem:[%s5271_s21 + $0x38] sm:$0xff]  }
 0x171   :  { %3502 = vmatprep.subr.bf16.mxu1 %v3965_v4 }
 0x174   :  { %3503 = vmatpush3.bf16.msra.mxu1 %v3855_v45  ;;  %v3881_v45 = vld [vmem:[%s5271_s21 + $0x30] sm:$0xff]  }
 0x175   :  { %3504 = vmatprep.subr.bf16.mxu1 %v3965_v4 }
 0x178   :  { %3505 = vmatpush3.bf16.msra.mxu1 %v3856_v46  ;;  %v3882_v46 = vld [vmem:[%s5271_s21 + $0x28] sm:$0xff]  }
 0x179   :  { %3506 = vmatprep.subr.bf16.mxu1 %v3965_v4 }
 0x17c   :  { %3507 = vmatpush3.bf16.msra.mxu1 %v3858_v47  ;;  %v3884_v47 = vld [vmem:[%s5271_s21 + $0x18] sm:$0xff]  }
 0x17d   :  { %3518 = vmatprep.subr.bf16.mxu1 %v3965_v4 }
 0x21f   :  { %v700_v56 = vpop.f32.mrf.mxu1 }
 0x220   :  { %v701_v57 = vadd.f32 %v700_v56, %v635_v54  ;;  %v3888_v54 = vld [vmem:[%s5272_s0] sm:$0xff]  }
 0x221   :  { %v702_v58 = vpop.f32.mrf.mxu1 }
 0x222   :  { %v707_v59 = vmax.f32 %v701_v57, 0.0  ;;  %v703_v60 = vadd.f32 %v702_v58, %v639_v55 }
 0x223   :  { %v704_v61 = vpop.f32.mrf.mxu1 }
 0x224   :  { %v709_v63 = vpack.c.bf16 %v707_v59, %v707_v59  ;;  %v708_v1 = vmax.f32 %v703_v60, 0.0 }
 0x225   :  { %v705_v2 = vpop.f32.mrf.mxu1 }
 0x226   :  { %v805_v5 = vpack.c.bf16 %v708_v1, %v708_v1  ;;  %3509 = vmatmul.mubr.bf16.vlgmr.msra.gmra.mxu1 %v709_v63  ;;  %v4351_v1 = vmul.u32 32, %v4211_v50 }
 0x227   :  { %3519 = vmatpush3.bf16.msra.mxu1 %v3865_v62  ;;  %3534 = vmatprep.mubr.msk.bf16.mxu1 %vm5221_vm0, %v3965_v4 }
 0x228   :  { %3515 = vmatmul.mubr.msk.bf16.vlgmr.msra.gmra.mxu0 %vm5219_vm6, %v805_v5  ;;  %3520 = vmatprep.subr.bf16.mxu1 %v3965_v4  ;;  %v1132_v5 = vld [vmem:[%s5195_s8] sm:$0x3]  ;;  %vm223_vm8 = vcmp.ge.s32.totalorder %v4151_v21, %v4351_v1 }
 0x229   :  { %941 = vmatpush1.bf16.msra.mxu0 %v3859_v3  ;;  %960 = vmatprep.mubr.bf16.mxu0 %v3963_v0 }
 0x22a   :  { %942 = vmatprep.subr.bf16.mxu0 %v3864_v6 }
 0x22b   :  { %3521 = vmatpush3.bf16.msra.mxu1 %v3866_v7 }
 0x22c   :  { %3522 = vmatprep.subr.bf16.mxu1 %v3965_v4 }
 0x22d   :  { %943 = vmatpush1.bf16.msra.mxu0 %v3862_v8  ;;  %v1156_v8 = vrot.slane %v1132_v5, %v4214_v51 }
 0x22e   :  { %3538 = vmatprep.subr.bf16.mxu0 %v3965_v4 }
 0x22f   :  { %3523 = vmatpush3.bf16.msra.mxu1 %v3867_v9  ;;  %v4358_v9 = vadd.s32 32, %v4351_v1 }
 0x230   :  { %3108 = vmatmul.mubr.msk.bf16.vlgmr.msra.gmra.mxu0 %vm5220_vm5, %v4170_v37  ;;  %3524 = vmatprep.subr.bf16.mxu1 %v3965_v4 }
 0x231   :  { %3540 = vmatprep.mubr.msk.bf16.mxu0 %vm5221_vm0, %v3965_v4  ;;  %3539 = vmatpush3.bf16.msra.mxu0 %v3872_v15  ;;  %vm225_vm9 = vcmp.lt.s32.totalorder %v4151_v21, %v4358_v9 }
 0x232   :  { %1195 = vmatprep.subr.bf16.mxu0 %v3876_v16  ;;  %vm226_vm10 = vmand %vm223_vm8, %vm225_vm9 }
 0x233   :  { %3525 = vmatpush3.bf16.msra.mxu1 %v3868_v10  ;;  %v4366_v24 = vsel %vm226_vm10, 1.0, %v3965_v4 }
 0x234   :  { %3526 = vmatprep.subr.bf16.mxu1 %v3965_v4 }
 0x237   :  { %3527 = vmatpush3.bf16.msra.mxu1 %v3869_v11  ;;  %v1160_v11 = vrot.slane %v1132_v5, %v4220_v53  ;;  %v230_v5 = vadd.s32 16, %v4211_v50 }
 0x238   :  { %3528 = vmatprep.subr.bf16.mxu1 %v3965_v4 }
 0x23b   :  { %3529 = vmatpush3.bf16.msra.mxu1 %v3870_v12 }
 0x23c   :  { %3530 = vmatprep.subr.bf16.mxu1 %v3965_v4 }
 0x23f   :  { %3531 = vmatpush3.bf16.msra.mxu1 %v3871_v13 }
 0x240   :  { %3532 = vmatprep.subr.bf16.mxu1 %v3965_v4 }
 0x243   :  { %3533 = vmatpush3.bf16.msra.mxu1 %v3873_v14 }
 0x244   :  { %3564 = vmatprep.subr.bf16.mxu1 %v3965_v4 }
 0x2e6   :  { %v4280_v17 = vpop.f32.mrf.mxu1 }
 0x2e8   :  { %v3510_v18 = vpop.f32.mrf.mxu1  ;;  %v4282_v19 = vpop.f32.mrf.mxu0 }
 0x2e9   :  { %v857_v20 = vsel %vm5223_vm7, %v4282_v19, -inf }
 0x2ea   :  { %v801_v22 = vpop.f32.mrf.mxu1  ;;  %858 = vmax.xlane.f32.xlu1 %v857_v20  ;;  %v3516_v23 = vpop.f32.mrf.mxu0 }
 0x2ec   :  { %v3511_v25 = vpop.f32.mrf.mxu1  ;;  %v853_v26 = vpop.f32.mrf.mxu0 }
 0x2ee   :  { %v3517_v28 = vpop.f32.mrf.mxu0 }
 0x2f0   :  { %v962_v30 = vpop.f32.mrf.mxu0 }
 0x2f1   :  { %v963_v31 = vadd.f32 %v962_v30, %v901_v27 }
 0x2f2   :  { %v964_v32 = vpop.f32.mrf.mxu0 }
 0x2f3   :  { %v969_v33 = vmax.f32 %v963_v31, 0.0  ;;  %v965_v34 = vadd.f32 %v964_v32, %v905_v29 }
 0x2f4   :  { %v966_v35 = vpop.f32.mrf.mxu0 }
 0x2f5   :  { %v971_v36 = vpack.c.bf16 %v969_v33, %v969_v33  ;;  %v970_v38 = vmax.f32 %v965_v34, 0.0  ;;  %v243_v33 = vadd.s32 120, %v4211_v50  ;;  %v4388_v34 = vadd.s32 32, %v4151_v21 }
 0x2f6   :  { %v967_v39 = vpop.f32.mrf.mxu0  ;;  %v4391_v35 = vadd.s32 64, %v4151_v21 }
 0x2f7   :  { %v1067_v41 = vpack.c.bf16 %v970_v38, %v970_v38  ;;  %3535 = vmatmul.mubr.bf16.vlgmr.msra.gmra.mxu1 %v971_v36  ;;  %vm259_vm12 = vcmp.eq.s32.totalorder %v243_v33, %v4151_v21  ;;  %vm276_vm13 = vcmp.eq.s32.totalorder %v243_v33, %v4388_v34  ;;  %v4396_v36 = vadd.s32 96, %v4151_v21 }
 0x2f8   :  { %3566 = vmatprep.mubr.msk.bf16.mxu1 %vm5221_vm0, %v3965_v4  ;;  %3565 = vmatpush3.bf16.msra.mxu1 %v3888_v54  ;;  %v242_v38 = vadd.s32 112, %v4211_v50  ;;  %vm292_vm14 = vmor %vm259_vm12, %vm276_vm13  ;;  %vm309_vm15 = vcmp.eq.s32.totalorder %v243_v33, %v4391_v35  ;;  %v241_v39 = vadd.s32 104, %v4211_v50  ;;  %v235_v54 = vadd.s32 56, %v4211_v50 }
 0x2f9   :  { %3541 = vmatmul.mubr.msk.bf16.vlgmr.msra.gmra.mxu0 %vm5219_vm6, %v1067_v41  ;;  %3570 = vmatprep.subr.mxu1 %v3965_v4  ;;  %vm325_vm1 = vmor %vm292_vm14, %vm309_vm15  ;;  %vm342_vm2 = vcmp.eq.s32.totalorder %v243_v33, %v4396_v36  ;;  %v240_v41 = vadd.s32 96, %v4211_v50 }
 0x2fa   :  { %1196 = vmatpush1.bf16.msra.mxu0 %v3874_v40  ;;  %1215 = vmatprep.mubr.bf16.mxu0 %v3963_v0  ;;  %vm258_vm3 = vcmp.eq.s32.totalorder %v242_v38, %v4151_v21  ;;  %vm275_vm4 = vcmp.eq.s32.totalorder %v242_v38, %v4388_v34  ;;  %vm4404_vm8 = vmor %vm325_vm1, %vm342_vm2  ;;  %vm308_vm9 = vcmp.eq.s32.totalorder %v242_v38, %v4391_v35  ;;  %v3245_v40 = vld [vmem:[%s5206_s15 + $0x1] ss:$0 sm:$0xff] }
 0x2fb   :  { %1197 = vmatprep.subr.bf16.mxu0 %v3879_v42  ;;  %vm341_vm10 = vcmp.eq.s32.totalorder %v242_v38, %v4396_v36  ;;  %v3969_v42 = vmov 1.0   ;;  %vm291_vm12 = vmor %vm258_vm3, %vm275_vm4  ;;  %vm257_vm13 = vcmp.eq.s32.totalorder %v241_v39, %v4151_v21  ;;  %vm274_vm14 = vcmp.eq.s32.totalorder %v241_v39, %v4388_v34 }
 0x2fc   :  { %vm324_vm15 = vmor %vm291_vm12, %vm308_vm9  ;;  %vm307_vm1 = vcmp.eq.s32.totalorder %v241_v39, %v4391_v35  ;;  %vm256_vm4 = vcmp.eq.s32.totalorder %v240_v41, %v4151_v21 }
 0x2fd   :  { %vm4418_vm2 = vmor %vm324_vm15, %vm341_vm10  ;;  %vm306_vm10 = vcmp.eq.s32.totalorder %v240_v41, %v4391_v35  ;;  %vm339_vm15 = vcmp.eq.s32.totalorder %v240_v41, %v4396_v36 }
 0x2fe   :  { %1198 = vmatpush1.bf16.msra.mxu0 %v3877_v43  ;;  %vm290_vm3 = vmor %vm257_vm13, %vm274_vm14 }
 0x2ff   :  { %3544 = vmatprep.subr.bf16.mxu0 %v3965_v4  ;;  %vm323_vm9 = vmor %vm290_vm3, %vm307_vm1 }
 0x301   :  { %3124 = vmatmul.mubr.msk.bf16.vlgmr.msra.gmra.mxu0 %vm5220_vm5, %v4170_v37  ;;  %v3883_v37 = vld [vmem:[%s5271_s21 + $0x20] sm:$0xff]  }
 0x302   :  { %3560 = vmatprep.mubr.msk.bf16.mxu0 %vm5221_vm0, %v3965_v4  ;;  %3545 = vmatpush3.bf16.msra.mxu0 %v3880_v44  ;;  %v239_v44 = vadd.s32 88, %v4211_v50 }
 0x303   :  { %3546 = vmatprep.subr.bf16.mxu0 %v3965_v4 }
 0x304   :  { %vm255_vm14 = vcmp.eq.s32.totalorder %v239_v44, %v4151_v21  ;;  %vm272_vm5 = vcmp.eq.s32.totalorder %v239_v44, %v4388_v34 }
 0x306   :  { %3547 = vmatpush3.bf16.msra.mxu0 %v3881_v45  ;;  %v238_v45 = vadd.s32 80, %v4211_v50 }
 0x307   :  { %3548 = vmatprep.subr.bf16.mxu0 %v3965_v4 }
 0x30a   :  { %3549 = vmatpush3.bf16.msra.mxu0 %v3882_v46  ;;  %v5277_v46 = vmov 0 }
 0x30b   :  { %3550 = vmatprep.subr.bf16.mxu0 %v3965_v4 }
 0x30e   :  { %3551 = vmatpush3.bf16.msra.mxu0 %v3883_v37  ;;  %v237_v37 = vadd.s32 72, %v4211_v50 }
 0x30f   :  { %3552 = vmatprep.subr.bf16.mxu0 %v3965_v4 }
 0x312   :  { %3553 = vmatpush3.bf16.msra.mxu0 %v3884_v47  ;;  %v5279_v47 = vmov 0 }
 0x313   :  { %3554 = vmatprep.subr.bf16.mxu0 %v3965_v4 }
 0x316   :  { %3555 = vmatpush3.bf16.msra.mxu0 %v3885_v48  ;;  %v236_v48 = vadd.s32 64, %v4211_v50 }
 0x317   :  { %3556 = vmatprep.subr.bf16.mxu0 %v3965_v4 }
 0x31a   :  { %3557 = vmatpush3.bf16.msra.mxu0 %v3886_v49  ;;  %v5281_v49 = vmov 0 }
 0x31b   :  { %3558 = vmatprep.subr.bf16.mxu0 %v3965_v4 }
 0x31e   :  { %3559 = vmatpush3.bf16.msra.mxu0 %v3887_v52  ;;  %v5283_v52 = vmov 0 }
 0x31f   :  { %3610 = vmatprep.subr.mxu0 %v3965_v4 }
 0x373   :  { %v859_v55 = vpop.xlane.xlu1 %858 }
 0x374   :  { %v860_v56 = vsub.f32 %v4282_v19, %v859_v55  ;;  %v5285_v55 = vmov 0 }
 0x376   :  { %v861_v57 = vmul.f32 1.442695, %v860_v56  ;;  %v234_v56 = vadd.s32 48, %v4211_v50 }
 0x378   :  { %3939 = vpow2.f32 %v861_v57  ;;  %v233_v57 = vadd.s32 40, %v4211_v50 }
 0x385   :  { %v3940_v58 = vpop.eup %3939 }
 0x386   :  { %v863_v59 = vsel %vm5223_vm7, %v3940_v58, 0.0 }
 0x387   :  { %864 = vadd.xlane.f32.xlu0 %v863_v59  ;;  %v5287_v59 = vmov 0 }
 0x3b7   :  { %v4347_v60 = vpop.f32.mrf.mxu1 }
 0x3b9   :  { %v3536_v61 = vpop.f32.mrf.mxu1  ;;  %v1111_v62 = vpop.f32.mrf.mxu0 }
 0x3ba   :  { %v1117_v63 = vsel %vm5223_vm7, %v1111_v62, -inf  ;;  %v5289_v61 = vmov 0 }
 0x3bb   :  { %1118 = vmax.xlane.f32.xlu0 %v1117_v63  ;;  %v1063_v2 = vpop.f32.mrf.mxu1  ;;  %v3542_v3 = vpop.f32.mrf.mxu0  ;;  %v5293_v63 = vmov 0 }
 0x3bc   :  { %v231_v2 = vadd.s32 24, %v4211_v50  ;;  %v5295_v3 = vmov 0 }
 0x3bd   :  { %v3537_v6 = vpop.f32.mrf.mxu1  ;;  %v1114_v7 = vpop.f32.mrf.mxu0 }
 0x3be   :  { %v5297_v6 = vmov 0  ;;  %v229_v7 = vadd.s32 8, %v4211_v50 }
 0x3bf   :  { %v3543_v10 = vpop.f32.mrf.mxu0 }
 0x3c0   :  { %v5301_v10 = vmov 0 }
 0x3c1   :  { %v1217_v12 = vpop.f32.mrf.mxu0 }
 0x3c2   :  { %v1218_v13 = vadd.f32 %v1217_v12, %v1156_v8  ;;  %v5299_v8 = vmov 0  ;;  %v3125_v12 = vld [vmem:[%s5196_s10] ss:$0 sm:$0xff] }
 0x3c3   :  { %v1219_v14 = vpop.f32.mrf.mxu0 }
 0x3c4   :  { %v1224_v15 = vmax.f32 %v1218_v13, 0.0  ;;  %v1220_v16 = vadd.f32 %v1219_v14, %v1160_v11  ;;  %v5303_v11 = vmov 0 }
 0x3c5   :  { %v1221_v18 = vpop.f32.mrf.mxu0 }
 0x3c6   :  { %v1226_v19 = vpack.c.bf16 %v1224_v15, %v1224_v15  ;;  %v1225_v20 = vmax.f32 %v1220_v16, 0.0 }
 0x3c7   :  { %v1222_v22 = vpop.f32.mrf.mxu0 }
 0x3c8   :  { %v1322_v23 = vpack.c.bf16 %v1225_v20, %v1225_v20  ;;  %3561 = vmatmul.mubr.bf16.vlgmr.msra.gmra.mxu0 %v1226_v19 }
 0x3c9   :  { %3611 = vmatpush3.msk.msra.mxu0 %vm5218_vm11, %v4366_v24  ;;  %3612 = vmatprep.mubr.msk.f32.mxu0 %vm5221_vm0, %v3965_v4 }
 0x3ca   :  { %3567 = vmatmul.mubr.msk.bf16.vlgmr.msra.gmra.mxu1 %vm5219_vm6, %v1322_v23  ;;  %3615 = vmatprep.subr.mxu0 %v3965_v4  ;;  %vm273_vm6 = vcmp.eq.s32.totalorder %v240_v41, %v4388_v34 }
 0x3cb   :  { %3571 = vmatpush3.msk.msra.mxu1 %vm5218_vm11, %v4366_v24  ;;  %3572 = vmatprep.mubr.msk.f32.mxu1 %vm5221_vm0, %v3965_v4  ;;  %vm340_vm11 = vcmp.eq.s32.totalorder %v241_v39, %v4396_v36  ;;  %vm289_vm13 = vmor %vm256_vm4, %vm273_vm6  ;;  %vm304_vm4 = vcmp.eq.s32.totalorder %v238_v45, %v4391_v35 }
 0x3cc   :  { %3575 = vmatprep.subr.mxu1 %v3965_v4  ;;  %vm4432_vm12 = vmor %vm323_vm9, %vm340_vm11  ;;  %vm305_vm11 = vcmp.eq.s32.totalorder %v239_v44, %v4391_v35  ;;  %vm254_vm9 = vcmp.eq.s32.totalorder %v238_v45, %v4151_v21 }
 0x3cd   :  { %v5278_v46 = vsel %vm4432_vm12, 4294967295, %v5277_v46  ;;  %vm322_vm1 = vmor %vm289_vm13, %vm306_vm10  ;;  %vm270_vm13 = vcmp.eq.s32.totalorder %v237_v37, %v4388_v34 }
 0x3ce   :  { %vm4445_vm3 = vmor %vm322_vm1, %vm339_vm15  ;;  %vm253_vm15 = vcmp.eq.s32.totalorder %v237_v37, %v4151_v21 }
 0x3cf   :  { %v5280_v47 = vsel %vm4445_vm3, 4294967295, %v5279_v47  ;;  %vm288_vm6 = vmor %vm255_vm14, %vm272_vm5  ;;  %vm252_vm14 = vcmp.eq.s32.totalorder %v236_v48, %v4151_v21 }
 0x3d0   :  { %vm4457_vm10 = vmor %vm288_vm6, %vm305_vm11  ;;  %vm269_vm11 = vcmp.eq.s32.totalorder %v236_v48, %v4388_v34 }
 0x3d1   :  { %v5282_v49 = vsel %vm4457_vm10, 4294967295, %v5281_v49  ;;  %vm286_vm6 = vmor %vm253_vm15, %vm270_vm13  ;;  %vm250_vm13 = vcmp.eq.s32.totalorder %v234_v56, %v4151_v21 }
 0x3d2   :  { %vm285_vm15 = vmor %vm252_vm14, %vm269_vm11  ;;  %vm249_vm14 = vcmp.eq.s32.totalorder %v233_v57, %v4151_v21  ;;  %vm266_vm11 = vcmp.eq.s32.totalorder %v233_v57, %v4388_v34 }
 0x410   :  { %v865_v25 = vpop.xlane.xlu0 %864 }
 0x411   :  { %3941 = vrcp.f32 %v865_v25 }
 0x41e   :  { %v3942_v26 = vpop.eup %3941 }
 0x41f   :  { %v867_v27 = vmul.f32 %v3942_v26, %v3940_v58  ;;  %v232_v58 = vadd.s32 32, %v4211_v50 }
 0x421   :  { %3573 = vmatmul.mubr.msk.f32.vlgmr.msra.gmra.mxu1 %vm5223_vm7, %v867_v27 }
 0x422   :  { %3607 = vmatprep.mubr.msk.f32.mxu1 %vm5221_vm0, %v3965_v4  ;;  %3576 = vmatpush3.msk.msra.mxu1 %vm4404_vm8, %v3969_v42  ;;  %vm271_vm0 = vcmp.eq.s32.totalorder %v238_v45, %v4388_v34 }
 0x423   :  { %3577 = vmatprep.subr.mxu1 %v3965_v4  ;;  %vm287_vm1 = vmor %vm254_vm9, %vm271_vm0  ;;  %vm302_vm0 = vcmp.eq.s32.totalorder %v236_v48, %v4391_v35 }
 0x424   :  { %3578 = vmatpush3.msk.msra.mxu1 %vm4418_vm2, %v3969_v42  ;;  %vm4468_vm5 = vmor %vm287_vm1, %vm304_vm4  ;;  %vm251_vm4 = vcmp.eq.s32.totalorder %v235_v54, %v4151_v21  ;;  %vm268_vm1 = vcmp.eq.s32.totalorder %v235_v54, %v4388_v34 }
 0x425   :  { %3579 = vmatprep.subr.mxu1 %v3965_v4  ;;  %v5284_v52 = vsel %vm4468_vm5, 4294967295, %v5283_v52 }
 0x426   :  { %3580 = vmatpush3.msk.msra.mxu1 %vm4432_vm12, %v3969_v42 }
 0x427   :  { %3581 = vmatprep.subr.mxu1 %v3965_v4 }
 0x428   :  { %3582 = vmatpush3.msk.msra.mxu1 %vm4445_vm3, %v3969_v42 }
 0x429   :  { %3583 = vmatprep.subr.mxu1 %v3965_v4 }
 0x42a   :  { %3584 = vmatpush3.msk.msra.mxu1 %vm4457_vm10, %v3969_v42 }
 0x42b   :  { %3585 = vmatprep.subr.mxu1 %v3965_v4 }
 0x42c   :  { %3586 = vmatpush3.msk.msra.mxu1 %vm4468_vm5, %v3969_v42  ;;  %vm4502_vm5 = vmor %vm251_vm4, %vm268_vm1  ;;  %vm265_vm4 = vcmp.eq.s32.totalorder %v232_v58, %v4388_v34 }
 0x42d   :  { %3587 = vmatprep.subr.mxu1 %v3965_v4  ;;  %v5290_v61 = vsel %vm4502_vm5, 4294967295, %v5289_v61  ;;  %vm4519_vm1 = vmor %vm249_vm14, %vm266_vm11  ;;  %vm4548_vm14 = vcmp.eq.s32.totalorder %v230_v5, %v4151_v21  ;;  %vm4557_vm11 = vcmp.eq.s32.totalorder %v229_v7, %v4151_v21  ;;  %v3891_v5 = vld [vmem:[%s5198_s12 + $0x14] ss:$8 sps:$4 sm:$0xff]  }
 0x42e   :  { %v5294_v63 = vsel %vm4519_vm1, 4294967295, %v5293_v63  ;;  %v5300_v8 = vsel %vm4548_vm14, 4294967295, %v5299_v8  ;;  %v5302_v10 = vsel %vm4557_vm11, 4294967295, %v5301_v10 }
 0x444   :  { %v1119_v28 = vpop.xlane.xlu0 %1118 }
 0x445   :  { %v1120_v29 = vsub.f32 %v1111_v62, %v1119_v28  ;;  %v5291_v62 = vmov 0 }
 0x447   :  { %v1121_v30 = vmul.f32 1.442695, %v1120_v29 }
 0x449   :  { %3943 = vpow2.f32 %v1121_v30 }
 0x456   :  { %v4382_v31 = vpop.eup %3943 }
 0x457   :  { %v1123_v32 = vsel %vm5223_vm7, %v4382_v31, 0.0  ;;  %vm303_vm7 = vcmp.eq.s32.totalorder %v237_v37, %v4391_v35 }
 0x458   :  { %1124 = vadd.xlane.f32.xlu1 %v1123_v32  ;;  %vm4480_vm9 = vmor %vm286_vm6, %vm303_vm7  ;;  %vm267_vm6 = vcmp.eq.s32.totalorder %v234_v56, %v4388_v34  ;;  %v3109_v56 = vld [vmem:[%s5197_s5 + $0x1] ss:$0 sm:$0xff] }
 0x459   :  { %v5286_v55 = vsel %vm4480_vm9, 4294967295, %v5285_v55  ;;  %3588 = vmatpush3.msk.msra.mxu1 %vm4480_vm9, %v3969_v42  ;;  %vm4493_vm7 = vmor %vm285_vm15, %vm302_vm0  ;;  %vm248_vm15 = vcmp.eq.s32.totalorder %v232_v58, %v4151_v21  ;;  %v1061_v57 = vadd.f32 %v3109_v56, %v4347_v60  ;;  %v4672_v58 = vadd.s32 128, %v4151_v21 }
 0x45a   :  { %3589 = vmatprep.subr.mxu1 %v3965_v4  ;;  %v5288_v59 = vsel %vm4493_vm7, 4294967295, %v5287_v59  ;;  %vm4509_vm0 = vmor %vm250_vm13, %vm267_vm6  ;;  %vm4538_vm6 = vcmp.eq.s32.totalorder %v231_v2, %v4151_v21  ;;  %v397_v56 = vadd.s32 128, %v4211_v50 }
 0x45b   :  { %3590 = vmatpush3.msk.msra.mxu1 %vm4493_vm7, %v3969_v42  ;;  %v5292_v62 = vsel %vm4509_vm0, 4294967295, %v5291_v62  ;;  %vm4528_vm13 = vmor %vm248_vm15, %vm265_vm4  ;;  %v5298_v6 = vsel %vm4538_vm6, 4294967295, %v5297_v6  ;;  %vm4567_vm15 = vcmp.eq.s32.totalorder %v4211_v50, %v4151_v21  ;;  %vm5228_vm4 = vcmask 48128  }
 0x45c   :  { %3591 = vmatprep.subr.mxu1 %v3965_v4  ;;  %v5296_v3 = vsel %vm4528_vm13, 4294967295, %v5295_v3  ;;  %v5304_v11 = vsel %vm4567_vm15, 4294967295, %v5303_v11  ;;  %v1066_v2 = vmax.f32 %v1061_v57, 0.0  ;;  %v3906_v57 = vld [vmem:[%s5198_s12 + $0x34] ss:$8 sps:$4 sm:$0xff]  }
 0x45d   :  { %3592 = vmatpush3.msk.msra.mxu1 %vm4502_vm5, %v3969_v42 }
 0x45e   :  { %3593 = vmatprep.subr.mxu1 %v3965_v4 }
 0x45f   :  { %3594 = vmatpush3.msk.msra.mxu1 %vm4509_vm0, %v3969_v42 }
 0x460   :  { %3595 = vmatprep.subr.mxu1 %v3965_v4 }
 0x461   :  { %3596 = vmatpush3.msk.msra.mxu1 %vm4519_vm1, %v3969_v42 }
 0x462   :  { %3597 = vmatprep.subr.mxu1 %v3965_v4 }
 0x463   :  { %3598 = vmatpush3.msk.msra.mxu1 %vm4528_vm13, %v3969_v42 }
 0x464   :  { %3599 = vmatprep.subr.mxu1 %v3965_v4 }
 0x465   :  { %3600 = vmatpush3.msk.msra.mxu1 %vm4538_vm6, %v3969_v42 }
 0x466   :  { %3601 = vmatprep.subr.mxu1 %v3965_v4 }
 0x467   :  { %3602 = vmatpush3.msk.msra.mxu1 %vm4548_vm14, %v3969_v42 }
 0x468   :  { %3603 = vmatprep.subr.mxu1 %v3965_v4 }
 0x469   :  { %3604 = vmatpush3.msk.msra.mxu1 %vm4557_vm11, %v3969_v42 }
 0x46a   :  { %3605 = vmatprep.subr.mxu1 %v3965_v4 }
 0x46b   :  { %3606 = vmatpush3.msk.msra.mxu1 %vm4567_vm15, %v3969_v42  ;;  %vm5305_vm15 = vcmask 31744  }
 0x488   :  { %v1315_v13 = vpop.f32.mrf.mxu0 }
 0x489   :  { %v4581_v14 = vadd.f32 %v3125_v12, %v1315_v13 }
 0x48a   :  { %v3562_v15 = vpop.f32.mrf.mxu0  ;;  %v1366_v16 = vpop.f32.mrf.mxu1 }
 0x48b   :  { %v1321_v18 = vmax.f32 %v4581_v14, 0.0  ;;  %v1373_v19 = vsel %vm5228_vm4, %v1366_v16, -inf  ;;  %vm5306_vm4 = vmmov 0   ;;  %v3894_v15 = vld [vmem:[%s5198_s12 + $0x4] ss:$8 sps:$4 sm:$0xff]  }
 0x48c   :  { %v1318_v20 = vpop.f32.mrf.mxu0  ;;  %1374 = vmax.xlane.f32.xlu1 %v1373_v19  ;;  %v3568_v22 = vpop.f32.mrf.mxu1  ;;  %v3892_v19 = vld [vmem:[%s5198_s12] ss:$8 sps:$4 sm:$0xff]   ;;  %v3904_v14 = vld [vmem:[%s5198_s12 + $0x30] ss:$8 sps:$4 sm:$0xff]  }
 0x48d   :  { %1385 = vrot.lane.b32.xlu0 %v1321_v18, %s3970_s4 }
 0x48e   :  { %v3563_v23 = vpop.f32.mrf.mxu0  ;;  %v1369_v25 = vpop.f32.mrf.mxu1 }
 0x48f   :  { %v3895_v25 = vld [vmem:[%s5199_s14 + $0x38] sm:$0xff]  }
 0x490   :  { %v3569_v26 = vpop.f32.mrf.mxu1 }
 0x4e1   :  { %v1125_v27 = vpop.xlane.xlu1 %1124  ;;  %v1463_v28 = vpop.f32.mrf.mxu1 }
 0x4e2   :  { %3945 = vrcp.f32 %v1125_v27 }
 0x4e3   :  { %v3574_v29 = vpop.f32.mrf.mxu1 }
 0x4e4   :  { %v3897_v29 = vld [vmem:[%s5199_s14 + $0x28] sm:$0xff]  }
 0x4ef   :  { %v3946_v30 = vpop.eup %3945 }
 0x4f0   :  { %v1127_v32 = vmul.f32 %v3946_v30, %v4382_v31  ;;  %v3069_v31 = vld [vmem:[%s5197_s5] ss:$0 sm:$0xff]  ;;  %v404_v30 = vadd.s32 184, %v4211_v50 }
 0x4f1   :  { %v4611_v33 = vadd.f32 %v3069_v31, %v4280_v17  ;;  %v403_v31 = vadd.s32 176, %v4211_v50 }
 0x4f2   :  { %3613 = vmatmul.mubr.msk.f32.vlgmr.msra.gmra.mxu0 %vm5305_vm15, %v1127_v32  ;;  %vm5229_vm15 = vcmask 523264   ;;  %v509_v32 = vadd.s32 160, %v4151_v21  ;;  %v401_v21 = vadd.s32 160, %v4211_v50 }
 0x4f3   :  { %3616 = vmatpush3.msk.msra.mxu0 %vm4404_vm8, %v3969_v42  ;;  %3647 = vmatprep.mubr.msk.f32.mxu0 %vm5306_vm4, %v3965_v4  ;;  %vm5307_vm4 = vnez %v5284_v52  ;;  %v804_v38 = vmax.f32 %v4611_v33, 0.0 }
 0x4f4   :  { %3617 = vmatprep.subr.mxu0 %v3965_v4 }
 0x4f5   :  { %3618 = vmatpush3.msk.msra.mxu0 %vm4418_vm2, %v3969_v42 }
 0x4f6   :  { %3619 = vmatprep.subr.mxu0 %v3965_v4 }
 0x4f7   :  { %3620 = vmatpush3.msk.msra.mxu0 %vm4432_vm12, %v3969_v42 }
 0x4f8   :  { %3621 = vmatprep.subr.mxu0 %v3965_v4 }
 0x4f9   :  { %3622 = vmatpush3.msk.msra.mxu0 %vm4445_vm3, %v3969_v42 }
 0x4fa   :  { %3623 = vmatprep.subr.mxu0 %v3965_v4 }
 0x4fb   :  { %3624 = vmatpush3.msk.msra.mxu0 %vm4457_vm10, %v3969_v42 }
 0x4fc   :  { %3625 = vmatprep.subr.mxu0 %v3965_v4 }
 0x4fd   :  { %3626 = vmatpush3.msk.msra.mxu0 %vm5307_vm4, %v3969_v42 }
 0x4fe   :  { %3627 = vmatprep.subr.mxu0 %v3965_v4 }
 0x4ff   :  { %v1386_v39 = vpop.permute.xlu0 %1385  ;;  %3628 = vmatpush3.msk.msra.mxu0 %vm4480_vm9, %v3969_v42 }
 0x500   :  { %v1389_v17 = vsel %vm5229_vm15, %v804_v38, %v1386_v39  ;;  %3629 = vmatprep.subr.mxu0 %v3965_v4  ;;  %vm5308_vm15 = vnez %v5304_v11 }
 0x501   :  { %v1467_v41 = vmul.f32 %v1463_v28, %v1389_v17  ;;  %3630 = vmatpush3.msk.msra.mxu0 %vm4493_vm7, %v3969_v42  ;;  %v3896_v28 = vld [vmem:[%s5199_s14 + $0x30] sm:$0xff]   ;;  %v402_v17 = vadd.s32 168, %v4211_v50 }
 0x502   :  { %3631 = vmatprep.subr.mxu0 %v3965_v4 }
 0x503   :  { %3608 = vmatmul.mubr.f32.vlgmr.msra.gmra.mxu1 %v1467_v41  ;;  %3632 = vmatpush3.msk.msra.mxu0 %vm4502_vm5, %v3969_v42  ;;  %v3899_v41 = vld [vmem:[%s5199_s14 + $0x18] sm:$0xff]  }
 0x504   :  { %3633 = vmatprep.subr.mxu0 %v3965_v4  ;;  %1761 = vmatprep.mubr.f32.mxu1 %v3965_v4 }
 0x505   :  { %3634 = vmatpush3.msk.msra.mxu0 %vm4509_vm0, %v3969_v42 }
 0x506   :  { %3635 = vmatprep.subr.mxu0 %v3965_v4 }
 0x507   :  { %3636 = vmatpush3.msk.msra.mxu0 %vm4519_vm1, %v3969_v42 }
 0x508   :  { %3637 = vmatprep.subr.mxu0 %v3965_v4 }
 0x509   :  { %3638 = vmatpush3.msk.msra.mxu0 %vm4528_vm13, %v3969_v42  ;;  %vm5310_vm13 = vcmask 523264  }
 0x50a   :  { %3639 = vmatprep.subr.mxu0 %v3965_v4  ;;  %v1538_v7 = vsel %vm5310_vm13, %v1066_v2, %v1386_v39  ;;  %vm5311_vm13 = vcmask 48128   ;;  %v3898_v39 = vld [vmem:[%s5199_s14 + $0x20] sm:$0xff]  }
 0x50b   :  { %3640 = vmatpush3.msk.msra.mxu0 %vm4538_vm6, %v3969_v42  ;;  %vm5309_vm6 = vcmask 48128  }
 0x50c   :  { %3641 = vmatprep.subr.mxu0 %v3965_v4 }
 0x50d   :  { %3642 = vmatpush3.msk.msra.mxu0 %vm4548_vm14, %v3969_v42 }
 0x50e   :  { %3643 = vmatprep.subr.mxu0 %v3965_v4 }
 0x50f   :  { %3644 = vmatpush3.msk.msra.mxu0 %vm4557_vm11, %v3969_v42  ;;  %vm1691_vm11 = vcmask 1045504  }
 0x510   :  { %3645 = vmatprep.subr.mxu0 %v3965_v4 }
 0x511   :  { %3646 = vmatpush3.msk.msra.mxu0 %vm5308_vm15, %v3969_v42  ;;  %vm392_vm15 = vcmp.ge.s32.totalorder %v4672_v58, %v4351_v1  ;;  %v3889_v1 = vld [vmem:[%s5198_s12 + $0x10] ss:$8 sps:$4 sm:$0xff]  }
 0x512   :  { %1914 = vmatprep.subr.bf16.mxu0 %v3891_v5 }
 0x515   :  { %v1375_v44 = vpop.xlane.xlu1 %1374 }
 0x516   :  { %v1376_v45 = vsub.f32 %v1366_v16, %v1375_v44  ;;  %v400_v44 = vadd.s32 152, %v4211_v50 }
 0x518   :  { %v1377_v37 = vmul.f32 1.442695, %v1376_v45  ;;  %v3900_v45 = vld [vmem:[%s5199_s14 + $0x10] sm:$0xff]  }
 0x51a   :  { %3947 = vpow2.f32 %v1377_v37  ;;  %v399_v37 = vadd.s32 144, %v4211_v50 }
 0x527   :  { %v3948_v48 = vpop.eup %3947 }
 0x528   :  { %v1379_v54 = vsel %vm5309_vm6, %v3948_v48, 0.0  ;;  %vm393_vm6 = vcmp.lt.s32.totalorder %v4672_v58, %v4358_v9 }
 0x529   :  { %1380 = vadd.xlane.f32.xlu1 %v1379_v54  ;;  %vm394_vm14 = vmand %vm392_vm15, %vm393_vm6  ;;  %vm5314_vm15 = vnez %v5296_v3  ;;  %vm5315_vm6 = vnez %v5298_v6  ;;  %v3901_v54 = vld [vmem:[%s5199_s14 + $0x8] sm:$0xff]  }
 0x52a   :  { %v3039_v60 = vsel %vm394_vm14, 1.0, %v3965_v4  ;;  %vm5312_vm14 = vcmask 261120  }
 0x52b   :  { %3172 = vmatprep.subr.msk.mxu1 %vm1691_vm11, %v3039_v60 }
 0x52c   :  { %3173 = vmatpush1.msk.msra.mxu1 %vm1691_vm11, %v4366_v24  ;;  %vm5313_vm11 = vmmov 0  }
 0x52d   :  { %1773 = vmatprep.subr.mxu1 %v3965_v4 }
 0x53a   :  { %1684 = vrot.lane.b32.xlu1 %v1066_v2, %s3970_s4 }
 0x5b2   :  { %v1608_v12 = vpop.f32.mrf.mxu0  ;;  %v1381_v13 = vpop.xlane.xlu1 %1380 }
 0x5b3   :  { %v1612_v9 = vmul.f32 %v1608_v12, %v1538_v7  ;;  %3949 = vrcp.f32 %v1381_v13 }
 0x5b4   :  { %v3614_v16 = vpop.f32.mrf.mxu0 }
 0x5b5   :  { %3648 = vmatmul.mubr.f32.vlgmr.msra.gmra.mxu0 %v1612_v9  ;;  %v3903_v9 = vld [vmem:[%s5200_s16] sm:$0xff]  }
 0x5b6   :  { %1915 = vmatpush1.bf16.msra.mxu0 %v3889_v1  ;;  %1934 = vmatprep.mubr.bf16.mxu0 %v3963_v0 }
 0x5b7   :  { %1916 = vmatprep.subr.bf16.mxu0 %v3894_v15 }
 0x5ba   :  { %1917 = vmatpush1.bf16.msra.mxu0 %v3892_v19 }
 0x5bb   :  { %3650 = vmatprep.subr.bf16.mxu0 %v3965_v4 }
 0x5c0   :  { %v3950_v20 = vpop.eup %3949 }
 0x5c1   :  { %v1383_v22 = vmul.f32 %v3950_v20, %v3948_v48  ;;  %v398_v48 = vadd.s32 136, %v4211_v50  ;;  %v3902_v50 = vld [vmem:[%s5199_s14] sm:$0xff]  }
 0x5c3   :  { %v1534_v23 = vpop.f32.mrf.mxu1  ;;  %3174 = vmatmul.mubr.msk.f32.vlgmr.msra.gmra.mxu1 %vm5311_vm13, %v1383_v22  ;;  %vm5316_vm13 = vnez %v5300_v8 }
 0x5c4   :  { %v1867_v26 = vpack.c.bf16 %v1534_v23, %v1534_v23  ;;  %3175 = vmatpush1.msk.msra.mxu1 %vm4404_vm8, %v3969_v42 }
 0x5c5   :  { %v3609_v27 = vpop.f32.mrf.mxu1  ;;  %1775 = vmatprep.subr.mxu1 %v3965_v4 }
 0x5c6   :  { %3204 = vmatmul.mubr.msk.bf16.vlgmr.msra.gmra.mxu0 %vm5312_vm14, %v1867_v26  ;;  %3176 = vmatpush1.msk.msra.mxu1 %vm4418_vm2, %v3969_v42  ;;  %vm5317_vm14 = vnez %v5302_v10  ;;  %v3910_v26 = vld [vmem:[%s5199_s14 + $0x78] sm:$0xff]  }
 0x5c7   :  { %1777 = vmatprep.subr.mxu1 %v3965_v4  ;;  %3651 = vmatpush3.bf16.msra.mxu0 %v3895_v25 }
 0x5c8   :  { %3177 = vmatpush1.msk.msra.mxu1 %vm4432_vm12, %v3969_v42  ;;  %3652 = vmatprep.subr.bf16.mxu0 %v3965_v4 }
 0x5c9   :  { %1779 = vmatprep.subr.mxu1 %v3965_v4  ;;  %3666 = vmatprep.mubr.msk.bf16.mxu0 %vm5313_vm11, %v3965_v4 }
 0x5ca   :  { %3178 = vmatpush1.msk.msra.mxu1 %vm4445_vm3, %v3969_v42  ;;  %vm531_vm3 = vcmp.eq.s32.totalorder %v402_v17, %v509_v32 }
 0x5cb   :  { %1781 = vmatprep.subr.mxu1 %v3965_v4  ;;  %3653 = vmatpush3.bf16.msra.mxu0 %v3896_v28  ;;  %v3907_v28 = vld [vmem:[%s5198_s12 + $0x20] ss:$8 sps:$4 sm:$0xff]  }
 0x5cc   :  { %3179 = vmatpush1.msk.msra.mxu1 %vm4457_vm10, %v3969_v42  ;;  %3654 = vmatprep.subr.bf16.mxu0 %v3965_v4  ;;  %vm532_vm10 = vcmp.eq.s32.totalorder %v403_v31, %v509_v32 }
 0x5cd   :  { %1783 = vmatprep.subr.mxu1 %v3965_v4 }
 0x5ce   :  { %3180 = vmatpush1.msk.msra.mxu1 %vm5307_vm4, %v3969_v42 }
 0x5cf   :  { %1785 = vmatprep.subr.mxu1 %v3965_v4  ;;  %3655 = vmatpush3.bf16.msra.mxu0 %v3897_v29  ;;  %v3911_v29 = vld [vmem:[%s5199_s14 + $0x70] sm:$0xff]  }
 0x5d0   :  { %3181 = vmatpush1.msk.msra.mxu1 %vm4480_vm9, %v3969_v42  ;;  %3656 = vmatprep.subr.bf16.mxu0 %v3965_v4  ;;  %vm483_vm9 = vcmp.eq.s32.totalorder %v403_v31, %v4672_v58 }
 0x5d1   :  { %1787 = vmatprep.subr.mxu1 %v3965_v4 }
 0x5d2   :  { %3182 = vmatpush1.msk.msra.mxu1 %vm4493_vm7, %v3969_v42  ;;  %vm451_vm7 = vcmp.eq.s32.totalorder %v403_v31, %v4396_v36 }
 0x5d3   :  { %1789 = vmatprep.subr.mxu1 %v3965_v4  ;;  %3657 = vmatpush3.bf16.msra.mxu0 %v3898_v39  ;;  %v3914_v39 = vld [vmem:[%s5199_s14 + $0x58] sm:$0xff]  }
 0x5d4   :  { %3183 = vmatpush1.msk.msra.mxu1 %vm4502_vm5, %v3969_v42  ;;  %vm435_vm5 = vcmp.eq.s32.totalorder %v403_v31, %v4391_v35  ;;  %3658 = vmatprep.subr.bf16.mxu0 %v3965_v4  ;;  %v3913_v31 = vld [vmem:[%s5199_s14 + $0x60] sm:$0xff]  }
 0x5d5   :  { %1791 = vmatprep.subr.mxu1 %v3965_v4 }
 0x5d6   :  { %3184 = vmatpush1.msk.msra.mxu1 %vm4509_vm0, %v3969_v42  ;;  %vm533_vm0 = vcmp.eq.s32.totalorder %v404_v30, %v509_v32 }
 0x5d7   :  { %1793 = vmatprep.subr.mxu1 %v3965_v4  ;;  %3659 = vmatpush3.bf16.msra.mxu0 %v3899_v41  ;;  %v3918_v41 = vld [vmem:[%s5199_s14 + $0x40] sm:$0xff]  }
 0x5d8   :  { %3185 = vmatpush1.msk.msra.mxu1 %vm4519_vm1, %v3969_v42  ;;  %3660 = vmatprep.subr.bf16.mxu0 %v3965_v4 }
 0x5d9   :  { %1795 = vmatprep.subr.mxu1 %v3965_v4 }
 0x5da   :  { %3186 = vmatpush1.msk.msra.mxu1 %vm5314_vm15, %v3969_v42  ;;  %vm5318_vm15 = vnez %v5304_v11 }
 0x5db   :  { %1797 = vmatprep.subr.mxu1 %v3965_v4  ;;  %3661 = vmatpush3.bf16.msra.mxu0 %v3900_v45  ;;  %v3921_v45 = vld [vmem:[%s5202_s17 + $0x14] ss:$8 sps:$4 sm:$0xff]  }
 0x5dc   :  { %3187 = vmatpush1.msk.msra.mxu1 %vm5315_vm6, %v3969_v42  ;;  %vm452_vm6 = vcmp.eq.s32.totalorder %v404_v30, %v4396_v36  ;;  %3662 = vmatprep.subr.bf16.mxu0 %v3965_v4 }
 0x5dd   :  { %1799 = vmatprep.subr.mxu1 %v3965_v4 }
 0x5de   :  { %3188 = vmatpush1.msk.msra.mxu1 %vm5316_vm13, %v3969_v42  ;;  %vm436_vm13 = vcmp.eq.s32.totalorder %v404_v30, %v4391_v35 }
 0x5df   :  { %1801 = vmatprep.subr.mxu1 %v3965_v4  ;;  %3663 = vmatpush3.bf16.msra.mxu0 %v3901_v54 }
 0x5e0   :  { %3189 = vmatpush1.msk.msra.mxu1 %vm5317_vm14, %v3969_v42  ;;  %vm484_vm14 = vcmp.eq.s32.totalorder %v404_v30, %v4672_v58  ;;  %3664 = vmatprep.subr.bf16.mxu0 %v3965_v4 }
 0x5e1   :  { %1803 = vmatprep.subr.mxu1 %v3965_v4 }
 0x5e2   :  { %3190 = vmatpush1.msk.msra.mxu1 %vm5318_vm15, %v3969_v42  ;;  %vm460_vm15 = vmor %vm436_vm13, %vm452_vm6  ;;  %vm450_vm13 = vcmp.eq.s32.totalorder %v402_v17, %v4396_v36 }
 0x5e3   :  { %1821 = vmatprep.subr.mxu1 %v3965_v4  ;;  %vm508_vm1 = vmor %vm460_vm15, %vm484_vm14  ;;  %vm434_vm15 = vcmp.eq.s32.totalorder %v402_v17, %v4391_v35  ;;  %3665 = vmatpush3.bf16.msra.mxu0 %v3902_v50 }
 0x5e4   :  { %vm557_vm4 = vmor %vm508_vm1, %vm533_vm0  ;;  %vm482_vm0 = vcmp.eq.s32.totalorder %v402_v17, %v4672_v58  ;;  %2178 = vmatprep.subr.bf16.mxu0 %v3906_v57  ;;  %v3915_v17 = vld [vmem:[%s5199_s14 + $0x50] sm:$0xff]   ;;  %v3220_v57 = vld [vmem:[%s5201_s13 + $0x2] sm:$0x3] }
 0x5e5   :  { %3191 = vmatpush2.msk.msra.mxu1 %vm557_vm4, %v3969_v42  ;;  %vm459_vm6 = vmor %vm435_vm5, %vm451_vm7  ;;  %vm433_vm7 = vcmp.eq.s32.totalorder %v401_v21, %v4391_v35  ;;  %vm449_vm4 = vcmp.eq.s32.totalorder %v401_v21, %v4396_v36 }
 0x5e6   :  { %1823 = vmatprep.subr.mxu1 %v3965_v4  ;;  %vm507_vm14 = vmor %vm459_vm6, %vm483_vm9  ;;  %vm481_vm9 = vcmp.eq.s32.totalorder %v401_v21, %v4672_v58  ;;  %vm530_vm6 = vcmp.eq.s32.totalorder %v401_v21, %v509_v32  ;;  %v3912_v32 = vld [vmem:[%s5199_s14 + $0x68] sm:$0xff]  }
 0x5e7   :  { %vm556_vm1 = vmor %vm507_vm14, %vm532_vm10  ;;  %vm432_vm14 = vcmp.eq.s32.totalorder %v400_v44, %v4391_v35  ;;  %v3916_v21 = vld [vmem:[%s5199_s14 + $0x48] sm:$0xff]  }
 0x5e8   :  { %3192 = vmatpush2.msk.msra.mxu1 %vm556_vm1, %v3969_v42  ;;  %vm458_vm5 = vmor %vm434_vm15, %vm450_vm13  ;;  %vm416_vm13 = vcmp.eq.s32.totalorder %v400_v44, %v4388_v34  ;;  %vm448_vm1 = vcmp.eq.s32.totalorder %v400_v44, %v4396_v36 }
 0x5e9   :  { %1825 = vmatprep.subr.mxu1 %v3965_v4  ;;  %vm506_vm12 = vmor %vm458_vm5, %vm482_vm0 }
 0x5ea   :  { %vm555_vm10 = vmor %vm506_vm12, %vm531_vm3  ;;  %vm480_vm12 = vcmp.eq.s32.totalorder %v400_v44, %v4672_v58  ;;  %v3917_v44 = vld [vmem:[%s5200_s16 + $0x8] sm:$0xff]  }
 0x5eb   :  { %3193 = vmatpush2.msk.msra.mxu1 %vm555_vm10, %v3969_v42  ;;  %vm457_vm15 = vmor %vm433_vm7, %vm449_vm4  ;;  %vm415_vm7 = vcmp.eq.s32.totalorder %v399_v37, %v4388_v34  ;;  %vm431_vm4 = vcmp.eq.s32.totalorder %v399_v37, %v4391_v35  ;;  %vm447_vm10 = vcmp.eq.s32.totalorder %v399_v37, %v4396_v36 }
 0x5ec   :  { %1827 = vmatprep.subr.mxu1 %v3965_v4  ;;  %vm505_vm0 = vmor %vm457_vm15, %vm481_vm9  ;;  %vm479_vm15 = vcmp.eq.s32.totalorder %v399_v37, %v4672_v58 }
 0x5ed   :  { %vm554_vm5 = vmor %vm505_vm0, %vm530_vm6  ;;  %vm430_vm0 = vcmp.eq.s32.totalorder %v398_v48, %v4391_v35 }
 0x5ee   :  { %3194 = vmatpush2.msk.msra.mxu1 %vm554_vm5, %v3969_v42  ;;  %vm440_vm3 = vmor %vm416_vm13, %vm432_vm14  ;;  %vm414_vm14 = vcmp.eq.s32.totalorder %v398_v48, %v4388_v34  ;;  %vm446_vm5 = vcmp.eq.s32.totalorder %v398_v48, %v4396_v36 }
 0x5ef   :  { %1829 = vmatprep.subr.mxu1 %v3965_v4  ;;  %vm456_vm9 = vmor %vm440_vm3, %vm448_vm1  ;;  %vm478_vm3 = vcmp.eq.s32.totalorder %v398_v48, %v4672_v58 }
 0x5f0   :  { %vm504_vm6 = vmor %vm456_vm9, %vm480_vm12  ;;  %vm429_vm9 = vcmp.eq.s32.totalorder %v397_v56, %v4391_v35 }
 0x5f1   :  { %3195 = vmatpush2.msk.msra.mxu1 %vm504_vm6, %v3969_v42  ;;  %vm439_vm13 = vmor %vm415_vm7, %vm431_vm4  ;;  %vm413_vm4 = vcmp.eq.s32.totalorder %v397_v56, %v4388_v34  ;;  %vm445_vm6 = vcmp.eq.s32.totalorder %v397_v56, %v4396_v36  ;;  %v1847_v36 = vld [vmem:[%s5201_s13] sm:$0x3] }
 0x5f2   :  { %1831 = vmatprep.subr.mxu1 %v3965_v4  ;;  %vm455_vm1 = vmor %vm439_vm13, %vm447_vm10  ;;  %vm477_vm13 = vcmp.eq.s32.totalorder %v397_v56, %v4672_v58  ;;  %v1685_v58 = vpop.permute.xlu1 %1684  ;;  %v1872_v5 = vrot.slane %v1847_v36, %v4214_v51  ;;  %v1876_v7 = vrot.slane %v1847_v36, %v4220_v53 }
 0x5f3   :  { %vm503_vm12 = vmor %vm455_vm1, %vm479_vm15 }
 0x5f4   :  { %3196 = vmatpush2.msk.msra.mxu1 %vm503_vm12, %v3969_v42  ;;  %vm438_vm7 = vmor %vm414_vm14, %vm430_vm0 }
 0x5f5   :  { %1833 = vmatprep.subr.mxu1 %v3965_v4  ;;  %vm454_vm10 = vmor %vm438_vm7, %vm446_vm5  ;;  %vm5319_vm5 = vcmask 523264   ;;  %vm5322_vm7 = vcmask 261120  }
 0x5f6   :  { %vm502_vm15 = vmor %vm454_vm10, %vm478_vm3  ;;  %v1687_v12 = vsel %vm5319_vm5, %v804_v38, %v1685_v58  ;;  %v3909_v38 = vld [vmem:[%s5198_s12 + $0x24] ss:$8 sps:$4 sm:$0xff]   ;;  %vm5321_vm3 = vcmask 130048   ;;  %v2136_v58 = vrot.slane %v3220_v57, %v4214_v51 }
 0x5f7   :  { %3197 = vmatpush2.msk.msra.mxu1 %vm502_vm15, %v3969_v42  ;;  %vm437_vm14 = vmor %vm413_vm4, %vm429_vm9  ;;  %vm5323_vm4 = vcmask 31744   ;;  %vm5324_vm9 = vcmask 1043456  }
 0x5f8   :  { %1835 = vmatprep.subr.mxu1 %v3965_v4  ;;  %vm453_vm0 = vmor %vm437_vm14, %vm445_vm6 }
 0x5f9   :  { %vm501_vm1 = vmor %vm453_vm0, %vm477_vm13 }
 0x5fa   :  { %3198 = vmatpush2.msk.msra.mxu1 %vm501_vm1, %v3969_v42  ;;  %vm5320_vm12 = vmmov %vm5319_vm5 }
 0x5fb   :  { %3670 = vmatprep.subr.bf16.mxu1 %v3965_v4  ;;  %vm5325_vm10 = vmmov %vm5321_vm3 }
 0x5fc   :  { %vm5326_vm6 = vmmov %vm5322_vm7 }
 0x5fd   :  { %vm5327_vm15 = vmmov %vm5323_vm4 }
 0x5fe   :  { %vm5328_vm13 = vmmov %vm5324_vm9 }
 0x5ff   :  { %vm5329_vm14 = vmmov %vm5323_vm4 }
 0x600   :  { %vm5330_vm0 = vmmov %vm5323_vm4 }
 0x601   :  { %vm5331_vm1 = vmmov %vm5330_vm0 }
 0x602   :  { %vm5332_vm5 = vmmov %vm5330_vm0 }
 0x675   :  { %v1679_v34 = vpop.f32.mrf.mxu0 }
 0x676   :  { %v2131_v30 = vpack.c.bf16 %v1679_v34, %v1679_v34 }
 0x677   :  { %v3649_v35 = vpop.f32.mrf.mxu0 }
 0x683   :  { %v1763_v2 = vpop.f32.mrf.mxu1 }
 0x684   :  { %v1768_v15 = vmul.f32 %v1763_v2, %v1687_v12 }
 0x685   :  { %v1765_v60 = vpop.f32.mrf.mxu1 }
 0x686   :  { %v1769_v13 = vmul.f32 %v1765_v60, %v1321_v18  ;;  %v1936_v1 = vpop.f32.mrf.mxu0  ;;  %v2140_v60 = vrot.slane %v3220_v57, %v4220_v53  ;;  %v3924_v53 = vld [vmem:[%s5202_s17 + $0x4] ss:$8 sps:$4 sm:$0xff]  }
 0x687   :  { %v1937_v16 = vadd.f32 %v1936_v1, %v1872_v5 }
 0x688   :  { %3199 = vmatprep.mubr.msk.f32.mxu1 %vm5320_vm12, %v1769_v13  ;;  %v1938_v19 = vpop.f32.mrf.mxu0  ;;  %vm5333_vm12 = vnez %v5278_v46  ;;  %v3205_v46 = vld [vmem:[%s5206_s15] ss:$0 sm:$0xff] }
 0x689   :  { %v1943_v20 = vmax.f32 %v1937_v16, 0.0  ;;  %v1939_v22 = vadd.f32 %v1938_v19, %v1876_v7  ;;  %1838 = vmatmul.mubr.f32.vlgmr.msra.gmra.mxu1 %v1768_v15 }
 0x68a   :  { %v1940_v23 = vpop.f32.mrf.mxu0  ;;  %3671 = vmatpush3.bf16.msra.mxu1 %v3903_v9  ;;  %3672 = vmatprep.mubr.msk.bf16.mxu1 %vm5313_vm11, %v3965_v4 }
 0x68b   :  { %v1945_v18 = vpack.c.bf16 %v1943_v20, %v1943_v20  ;;  %v1944_v33 = vmax.f32 %v1939_v22, 0.0  ;;  %3676 = vmatprep.subr.bf16.mxu1 %v3965_v4  ;;  %v3919_v23 = vld [vmem:[%s5202_s17 + $0x10] ss:$8 sps:$4 sm:$0xff]  }
 0x68c   :  { %v1941_v25 = vpop.f32.mrf.mxu0 }
 0x68d   :  { %v2041_v27 = vpack.c.bf16 %v1944_v33, %v1944_v33  ;;  %3667 = vmatmul.mubr.bf16.vlgmr.msra.gmra.mxu0 %v1945_v18  ;;  %v3922_v18 = vld [vmem:[%s5202_s17] ss:$8 sps:$4 sm:$0xff]   ;;  %v3925_v33 = vld [vmem:[%s5203_s19 + $0x38] sm:$0xff]   ;;  %v3926_v25 = vld [vmem:[%s5203_s19 + $0x30] sm:$0xff]  }
 0x68e   :  { %2179 = vmatpush1.bf16.msra.mxu0 %v3904_v14  ;;  %2198 = vmatprep.mubr.bf16.mxu0 %v3963_v0 }
 0x68f   :  { %3673 = vmatmul.mubr.msk.bf16.vlgmr.msra.gmra.mxu1 %vm5321_vm3, %v2041_v27  ;;  %2180 = vmatprep.subr.bf16.mxu0 %v3909_v38  ;;  %v3929_v27 = vld [vmem:[%s5203_s19 + $0x18] sm:$0xff]   ;;  %vm5334_vm3 = vnez %v5280_v47 }
 0x690   :  { %3677 = vmatpush3.bf16.msra.mxu1 %v3910_v26  ;;  %3692 = vmatprep.mubr.msk.bf16.mxu1 %vm5313_vm11, %v3965_v4  ;;  %v3928_v26 = vld [vmem:[%s5203_s19 + $0x20] sm:$0xff]  }
 0x691   :  { %3678 = vmatprep.subr.bf16.mxu1 %v3965_v4 }
 0x692   :  { %2181 = vmatpush1.bf16.msra.mxu0 %v3907_v28  ;;  %v3930_v28 = vld [vmem:[%s5203_s19 + $0x10] sm:$0xff]  }
 0x693   :  { %3696 = vmatprep.subr.bf16.mxu0 %v3965_v4 }
 0x694   :  { %3679 = vmatpush3.bf16.msra.mxu1 %v3911_v29  ;;  %v3931_v29 = vld [vmem:[%s5203_s19 + $0x8] sm:$0xff]  }
 0x695   :  { %3244 = vmatmul.mubr.msk.bf16.vlgmr.msra.gmra.mxu0 %vm5322_vm7, %v2131_v30  ;;  %3680 = vmatprep.subr.bf16.mxu1 %v3965_v4  ;;  %v3932_v30 = vld [vmem:[%s5203_s19] sm:$0xff]   ;;  %vm5337_vm7 = vnez %v5286_v55 }
 0x696   :  { %3698 = vmatprep.mubr.msk.bf16.mxu0 %vm5313_vm11, %v3965_v4  ;;  %3697 = vmatpush3.bf16.msra.mxu0 %v3917_v44  ;;  %v2370_v44 = vld [vmem:[%s5204_s18] sm:$0x3] }
 0x697   :  { %2430 = vmatprep.subr.bf16.mxu0 %v3921_v45 }
 0x698   :  { %3681 = vmatpush3.bf16.msra.mxu1 %v3912_v32 }
 0x699   :  { %3682 = vmatprep.subr.bf16.mxu1 %v3965_v4 }
 0x69c   :  { %3683 = vmatpush3.bf16.msra.mxu1 %v3913_v31 }
 0x69d   :  { %3684 = vmatprep.subr.bf16.mxu1 %v3965_v4 }
 0x6a0   :  { %3685 = vmatpush3.bf16.msra.mxu1 %v3914_v39 }
 0x6a1   :  { %3686 = vmatprep.subr.bf16.mxu1 %v3965_v4 }
 0x6a4   :  { %3687 = vmatpush3.bf16.msra.mxu1 %v3915_v17 }
 0x6a5   :  { %3688 = vmatprep.subr.bf16.mxu1 %v3965_v4 }
 0x6a8   :  { %3689 = vmatpush3.bf16.msra.mxu1 %v3916_v21 }
 0x6a9   :  { %3690 = vmatprep.subr.bf16.mxu1 %v3965_v4 }
 0x6ac   :  { %3691 = vmatpush3.bf16.msra.mxu1 %v3918_v41 }
 0x6ad   :  { %3722 = vmatprep.subr.mxu1 %v3965_v4 }
 0x749   :  { %v1839_v37 = vpop.f32.mrf.mxu1 }
 0x74a   :  { %v2388_v38 = vpack.c.bf16 %v1839_v37, %v1839_v37 }
 0x74b   :  { %v1841_v48 = vpop.f32.mrf.mxu1 }
 0x74c   :  { %v2393_v48 = vrot.slane %v2370_v44, %v4214_v51  ;;  %v3306_v44 = vld [vmem:[%s5209_s23] ss:$0 sm:$0xff] }
 0x74d   :  { %v4924_v54 = vpop.f32.mrf.mxu0 }
 0x74f   :  { %v3668_v56 = vpop.f32.mrf.mxu0  ;;  %v4926_v50 = vpop.f32.mrf.mxu1 }
 0x750   :  { %v2091_v34 = vsel %vm5323_vm4, %v4926_v50, -inf  ;;  %vm5338_vm4 = vnez %v5288_v59 }
 0x751   :  { %v2037_v35 = vpop.f32.mrf.mxu0  ;;  %2092 = vmax.xlane.f32.xlu1 %v2091_v34  ;;  %v3674_v36 = vpop.f32.mrf.mxu1 }
 0x753   :  { %v3669_v2 = vpop.f32.mrf.mxu0  ;;  %v2088_v5 = vpop.f32.mrf.mxu1 }
 0x755   :  { %v3675_v7 = vpop.f32.mrf.mxu1  ;;  %v2200_v12 = vpop.f32.mrf.mxu0 }
 0x756   :  { %v2201_v13 = vadd.f32 %v2200_v12, %v2136_v58 }
 0x757   :  { %v2202_v1 = vpop.f32.mrf.mxu0 }
 0x758   :  { %v2207_v9 = vmax.f32 %v2201_v13, 0.0  ;;  %v2203_v15 = vadd.f32 %v2202_v1, %v2140_v60 }
 0x759   :  { %v2204_v16 = vpop.f32.mrf.mxu0 }
 0x75a   :  { %v2209_v19 = vpack.c.bf16 %v2207_v9, %v2207_v9  ;;  %v2208_v20 = vmax.f32 %v2203_v15, 0.0 }
 0x75b   :  { %v2205_v22 = vpop.f32.mrf.mxu0 }
 0x75c   :  { %v2305_v14 = vpack.c.bf16 %v2208_v20, %v2208_v20  ;;  %3693 = vmatmul.mubr.bf16.vlgmr.msra.gmra.mxu1 %v2209_v19  ;;  %v3261_v19 = vld [vmem:[%s5205_s20] ss:$0 sm:$0xff] }
 0x75d   :  { %3723 = vmatpush3.msk.msra.mxu1 %vm5324_vm9, %v4366_v24  ;;  %3724 = vmatprep.mubr.msk.f32.mxu1 %vm5313_vm11, %v3965_v4  ;;  %vm5339_vm9 = vnez %v5290_v61 }
 0x75e   :  { %3699 = vmatmul.mubr.msk.bf16.vlgmr.msra.gmra.mxu0 %vm5325_vm10, %v2305_v14  ;;  %3727 = vmatprep.subr.mxu1 %v3965_v4  ;;  %vm5340_vm10 = vnez %v5292_v62 }
 0x75f   :  { %2431 = vmatpush1.bf16.msra.mxu0 %v3919_v23  ;;  %2450 = vmatprep.mubr.bf16.mxu0 %v3963_v0  ;;  %v3927_v0 = vld [vmem:[%s5203_s19 + $0x28] sm:$0xff]  }
 0x760   :  { %2432 = vmatprep.subr.bf16.mxu0 %v3924_v53 }
 0x763   :  { %2433 = vmatpush1.bf16.msra.mxu0 %v3922_v18 }
 0x764   :  { %3702 = vmatprep.subr.bf16.mxu0 %v3965_v4 }
 0x766   :  { %3260 = vmatmul.mubr.msk.bf16.vlgmr.msra.gmra.mxu0 %vm5326_vm6, %v2388_v38  ;;  %vm5341_vm6 = vnez %v5294_v63 }
 0x767   :  { %3703 = vmatpush3.bf16.msra.mxu0 %v3925_v33  ;;  %3718 = vmatprep.mubr.msk.bf16.mxu0 %vm5313_vm11, %v3965_v4 }
 0x768   :  { %3704 = vmatprep.subr.bf16.mxu0 %v3965_v4 }
 0x76b   :  { %3705 = vmatpush3.bf16.msra.mxu0 %v3926_v25 }
 0x76c   :  { %3706 = vmatprep.subr.bf16.mxu0 %v3965_v4 }
 0x76f   :  { %3707 = vmatpush3.bf16.msra.mxu0 %v3927_v0 }
 0x770   :  { %3708 = vmatprep.subr.bf16.mxu0 %v3965_v4 }
 0x773   :  { %3709 = vmatpush3.bf16.msra.mxu0 %v3928_v26 }
 0x774   :  { %3710 = vmatprep.subr.bf16.mxu0 %v3965_v4 }
 0x777   :  { %3711 = vmatpush3.bf16.msra.mxu0 %v3929_v27  ;;  %v3936_v27 = vld [vmem:[%s5207_s22] sm:$0xff]  }
 0x778   :  { %3712 = vmatprep.subr.bf16.mxu0 %v3965_v4 }
 0x77b   :  { %3713 = vmatpush3.bf16.msra.mxu0 %v3930_v28 }
 0x77c   :  { %3714 = vmatprep.subr.bf16.mxu0 %v3965_v4 }
 0x77f   :  { %3715 = vmatpush3.bf16.msra.mxu0 %v3931_v29 }
 0x780   :  { %3716 = vmatprep.subr.bf16.mxu0 %v3965_v4 }
 0x783   :  { %3717 = vmatpush3.bf16.msra.mxu0 %v3932_v30 }
 0x784   :  { %3762 = vmatprep.subr.mxu0 %v3965_v4 }
 0x7da   :  { %v2093_v60 = vpop.xlane.xlu1 %2092 }
 0x7db   :  { %v2094_v51 = vsub.f32 %v4926_v50, %v2093_v60 }
 0x7dd   :  { %v2095_v13 = vmul.f32 1.442695, %v2094_v51 }
 0x81c   :  { %v4987_v32 = vpop.f32.mrf.mxu1 }
 0x81d   :  { %v2299_v43 = vadd.f32 %v3245_v40, %v4987_v32 }
 0x81e   :  { %v3694_v31 = vpop.f32.mrf.mxu1  ;;  %v2349_v39 = vpop.f32.mrf.mxu0 }
 0x81f   :  { %v2355_v17 = vsel %vm5327_vm15, %v2349_v39, -inf  ;;  %vm5342_vm15 = vnez %v5296_v3 }
 0x820   :  { %2356 = vmax.xlane.f32.xlu0 %v2355_v17  ;;  %v2301_v21 = vpop.f32.mrf.mxu1  ;;  %v3700_v41 = vpop.f32.mrf.mxu0  ;;  %v3937_v17 = vld [vmem:[%s5208_s24 + $0x8] sm:$0xff]  }
 0x821   :  { %v3938_v41 = vld [vmem:[%s5208_s24] sm:$0xff]  }
 0x822   :  { %v3695_v45 = vpop.f32.mrf.mxu1  ;;  %v2352_v37 = vpop.f32.mrf.mxu0 }
 0x824   :  { %v3701_v56 = vpop.f32.mrf.mxu0 }
 0x826   :  { %v2452_v57 = vpop.f32.mrf.mxu0 }
 0x827   :  { %v2453_v34 = vadd.f32 %v2452_v57, %v2393_v48 }
 0x828   :  { %v2454_v35 = vpop.f32.mrf.mxu0 }
 0x829   :  { %v2458_v36 = vmax.f32 %v2453_v34, 0.0 }
 0x82a   :  { %v2455_v58 = vpop.f32.mrf.mxu0 }
 0x82b   :  { %v2459_v2 = vpack.c.bf16 %v2458_v36, %v2458_v36 }
 0x82c   :  { %v2456_v5 = vpop.f32.mrf.mxu0 }
 0x82d   :  { %3719 = vmatmul.mubr.bf16.vlgmr.msra.gmra.mxu0 %v2459_v2 }
 0x82e   :  { %3763 = vmatpush3.msk.msra.mxu0 %vm5328_vm13, %v4366_v24  ;;  %3764 = vmatprep.mubr.msk.f32.mxu0 %vm5313_vm11, %v3965_v4  ;;  %vm5343_vm13 = vnez %v5298_v6 }
 0x82f   :  { %3767 = vmatprep.subr.mxu0 %v3965_v4 }
 0x8a9   :  { %v2357_v7 = vpop.xlane.xlu0 %2356 }
 0x8aa   :  { %v2358_v12 = vsub.f32 %v2349_v39, %v2357_v7 }
 0x8ac   :  { %v2359_v1 = vmul.f32 1.442695, %v2358_v12 }
 0x8ae   :  { %3951 = vpow2.f32 %v2359_v1 }
 0x8af   :  { %3953 = vpow2.f32 %v2095_v13 }
 0x8bb   :  { %v3952_v9 = vpop.eup %3951 }
 0x8bc   :  { %v2361_v15 = vsel %vm5329_vm14, %v3952_v9, 0.0  ;;  %v3954_v16 = vpop.eup %3953  ;;  %vm5344_vm14 = vnez %v5300_v8 }
 0x8bd   :  { %2362 = vadd.xlane.f32.xlu0 %v2361_v15  ;;  %v2097_v24 = vsel %vm5330_vm0, %v3954_v16, 0.0  ;;  %vm5345_vm0 = vnez %v5302_v10  ;;  %v3933_v10 = vld [vmem:[%s5207_s22 + $0x18] sm:$0xff]  }
 0x8c1   :  { %2098 = vadd.xlane.f32.xlu0 %v2097_v24 }
 0x8ed   :  { %v2548_v20 = vpop.f32.mrf.mxu0 }
 0x8ee   :  { %v2549_v50 = vadd.f32 %v3261_v19, %v2548_v20 }
 0x8ef   :  { %v3720_v22 = vpop.f32.mrf.mxu0 }
 0x8f0   :  { %v2554_v23 = vmax.f32 %v2549_v50, 0.0 }
 0x8f1   :  { %v2551_v14 = vpop.f32.mrf.mxu0 }
 0x8f2   :  { %2556 = vrot.lane.b32.xlu0 %v2554_v23, %s3970_s4 }
 0x8f3   :  { %v3721_v53 = vpop.f32.mrf.mxu0 }
 0x946   :  { %v2363_v18 = vpop.xlane.xlu0 %2362 }
 0x947   :  { %3955 = vrcp.f32 %v2363_v18 }
 0x94a   :  { %v2099_v33 = vpop.xlane.xlu0 %2098 }
 0x94b   :  { %3957 = vrcp.f32 %v2099_v33 }
 0x954   :  { %v3956_v38 = vpop.eup %3955 }
 0x955   :  { %v2365_v25 = vmul.f32 %v3956_v38, %v3952_v9 }
 0x957   :  { %3765 = vmatmul.mubr.msk.f32.vlgmr.msra.gmra.mxu0 %vm5331_vm1, %v2365_v25  ;;  %vm5346_vm1 = vnez %v5304_v11  ;;  %v3934_v11 = vld [vmem:[%s5207_s22 + $0x10] sm:$0xff]  }
 0x958   :  { %v3958_v0 = vpop.eup %3957  ;;  %3768 = vmatpush3.msk.msra.mxu0 %vm4404_vm8, %v3969_v42  ;;  %3799 = vmatprep.mubr.msk.f32.mxu0 %vm5313_vm11, %v3965_v4 }
 0x959   :  { %v2101_v26 = vmul.f32 %v3958_v0, %v3954_v16  ;;  %3769 = vmatprep.subr.mxu0 %v3965_v4 }
 0x95a   :  { %3770 = vmatpush3.msk.msra.mxu0 %vm4418_vm2, %v3969_v42 }
 0x95b   :  { %3725 = vmatmul.mubr.msk.f32.vlgmr.msra.gmra.mxu1 %vm5332_vm5, %v2101_v26  ;;  %3771 = vmatprep.subr.mxu0 %v3965_v4  ;;  %vm5347_vm5 = vcmask 523264  }
 0x95c   :  { %3728 = vmatpush3.msk.msra.mxu1 %vm4404_vm8, %v3969_v42  ;;  %3772 = vmatpush3.msk.msra.mxu0 %vm5333_vm12, %v3969_v42  ;;  %vm5335_vm8 = vnez %v5282_v49  ;;  %v2035_v49 = vadd.f32 %v3205_v46, %v4924_v54  ;;  %v3935_v54 = vld [vmem:[%s5207_s22 + $0x8] sm:$0xff]  }
 0x95d   :  { %3729 = vmatprep.subr.mxu1 %v3965_v4  ;;  %3773 = vmatprep.subr.mxu0 %v3965_v4 }
 0x95e   :  { %3730 = vmatpush3.msk.msra.mxu1 %vm4418_vm2, %v3969_v42  ;;  %3774 = vmatpush3.msk.msra.mxu0 %vm5334_vm3, %v3969_v42  ;;  %vm5336_vm2 = vnez %v5284_v52  ;;  %v2304_v52 = vmax.f32 %v2299_v43, 0.0  ;;  %v2040_v61 = vmax.f32 %v2035_v49, 0.0 }
 0x95f   :  { %3731 = vmatprep.subr.mxu1 %v3965_v4  ;;  %3775 = vmatprep.subr.mxu0 %v3965_v4 }
 0x960   :  { %3732 = vmatpush3.msk.msra.mxu1 %vm5333_vm12, %v3969_v42  ;;  %3776 = vmatpush3.msk.msra.mxu0 %vm5335_vm8, %v3969_v42  ;;  %vm5348_vm12 = vmmov %vm5347_vm5 }
 0x961   :  { %3733 = vmatprep.subr.mxu1 %v3965_v4  ;;  %3777 = vmatprep.subr.mxu0 %v3965_v4 }
 0x962   :  { %3734 = vmatpush3.msk.msra.mxu1 %vm5334_vm3, %v3969_v42  ;;  %3778 = vmatpush3.msk.msra.mxu0 %vm5336_vm2, %v3969_v42  ;;  %vm5349_vm3 = vcmask 261120  }
 0x963   :  { %3735 = vmatprep.subr.mxu1 %v3965_v4  ;;  %3779 = vmatprep.subr.mxu0 %v3965_v4 }
 0x964   :  { %3736 = vmatpush3.msk.msra.mxu1 %vm5335_vm8, %v3969_v42  ;;  %3780 = vmatpush3.msk.msra.mxu0 %vm5337_vm7, %v3969_v42  ;;  %v2557_v47 = vpop.permute.xlu0 %2556  ;;  %vm5350_vm8 = vmmov %vm5347_vm5 }
 0x965   :  { %3737 = vmatprep.subr.mxu1 %v3965_v4  ;;  %3781 = vmatprep.subr.mxu0 %v3965_v4  ;;  %v2704_v55 = vsel %vm5347_vm5, %v2304_v52, %v2557_v47  ;;  %v2559_v63 = vsel %vm5348_vm12, %v2040_v61, %v2557_v47 }
 0x966   :  { %3738 = vmatpush3.msk.msra.mxu1 %vm5336_vm2, %v3969_v42  ;;  %3782 = vmatpush3.msk.msra.mxu0 %vm5338_vm4, %v3969_v42  ;;  %vm5351_vm2 = vmmov %vm5349_vm3 }
 0x967   :  { %3739 = vmatprep.subr.mxu1 %v3965_v4  ;;  %3783 = vmatprep.subr.mxu0 %v3965_v4 }
 0x968   :  { %3740 = vmatpush3.msk.msra.mxu1 %vm5337_vm7, %v3969_v42  ;;  %3784 = vmatpush3.msk.msra.mxu0 %vm5339_vm9, %v3969_v42 }
 0x969   :  { %3741 = vmatprep.subr.mxu1 %v3965_v4  ;;  %3785 = vmatprep.subr.mxu0 %v3965_v4 }
 0x96a   :  { %3742 = vmatpush3.msk.msra.mxu1 %vm5338_vm4, %v3969_v42  ;;  %3786 = vmatpush3.msk.msra.mxu0 %vm5340_vm10, %v3969_v42 }
 0x96b   :  { %3743 = vmatprep.subr.mxu1 %v3965_v4  ;;  %3787 = vmatprep.subr.mxu0 %v3965_v4 }
 0x96c   :  { %3744 = vmatpush3.msk.msra.mxu1 %vm5339_vm9, %v3969_v42  ;;  %3788 = vmatpush3.msk.msra.mxu0 %vm5341_vm6, %v3969_v42 }
 0x96d   :  { %3745 = vmatprep.subr.mxu1 %v3965_v4  ;;  %3789 = vmatprep.subr.mxu0 %v3965_v4 }
 0x96e   :  { %3746 = vmatpush3.msk.msra.mxu1 %vm5340_vm10, %v3969_v42  ;;  %3790 = vmatpush3.msk.msra.mxu0 %vm5342_vm15, %v3969_v42 }
 0x96f   :  { %3747 = vmatprep.subr.mxu1 %v3965_v4  ;;  %3791 = vmatprep.subr.mxu0 %v3965_v4 }
 0x970   :  { %3748 = vmatpush3.msk.msra.mxu1 %vm5341_vm6, %v3969_v42  ;;  %3792 = vmatpush3.msk.msra.mxu0 %vm5343_vm13, %v3969_v42 }
 0x971   :  { %3749 = vmatprep.subr.mxu1 %v3965_v4  ;;  %3793 = vmatprep.subr.mxu0 %v3965_v4 }
 0x972   :  { %3750 = vmatpush3.msk.msra.mxu1 %vm5342_vm15, %v3969_v42  ;;  %3794 = vmatpush3.msk.msra.mxu0 %vm5344_vm14, %v3969_v42 }
 0x973   :  { %3751 = vmatprep.subr.mxu1 %v3965_v4  ;;  %3795 = vmatprep.subr.mxu0 %v3965_v4 }
 0x974   :  { %3752 = vmatpush3.msk.msra.mxu1 %vm5343_vm13, %v3969_v42  ;;  %3796 = vmatpush3.msk.msra.mxu0 %vm5345_vm0, %v3969_v42 }
 0x975   :  { %3753 = vmatprep.subr.mxu1 %v3965_v4  ;;  %3797 = vmatprep.subr.mxu0 %v3965_v4 }
 0x976   :  { %3754 = vmatpush3.msk.msra.mxu1 %vm5344_vm14, %v3969_v42  ;;  %3798 = vmatpush3.msk.msra.mxu0 %vm5346_vm1, %v3969_v42 }
 0x977   :  { %3755 = vmatprep.subr.mxu1 %v3965_v4  ;;  %3759 = vmatprep.mubr.msk.f32.mxu1 %vm5313_vm11, %v3965_v4 }
 0x978   :  { %3756 = vmatpush3.msk.msra.mxu1 %vm5345_vm0, %v3969_v42 }
 0x979   :  { %3757 = vmatprep.subr.mxu1 %v3965_v4 }
 0x97a   :  { %3758 = vmatpush3.msk.msra.mxu1 %vm5346_vm1, %v3969_v42 }
 0x97b   :  { %3802 = vmatprep.subr.bf16.mxu1 %v3965_v4 }
 0xa17   :  { %v2774_v59 = vpop.f32.mrf.mxu0 }
 0xa18   :  { %v2778_v42 = vmul.f32 %v2774_v59, %v2704_v55 }
 0xa19   :  { %v3766_v62 = vpop.f32.mrf.mxu0 }
 0xa1a   :  { %3800 = vmatmul.mubr.f32.vlgmr.msra.gmra.mxu0 %v2778_v42 }
 0xa1b   :  { %v2629_v3 = vpop.f32.mrf.mxu1 }
 0xa1c   :  { %v2633_v6 = vmul.f32 %v2629_v3, %v2559_v63 }
 0xa1d   :  { %v3726_v8 = vpop.f32.mrf.mxu1 }
 0xa1e   :  { %3760 = vmatmul.mubr.f32.vlgmr.msra.gmra.mxu1 %v2633_v6 }
 0xa1f   :  { %3810 = vmatprep.mubr.msk.bf16.mxu1 %vm5313_vm11, %v3965_v4  ;;  %3803 = vmatpush3.bf16.msra.mxu1 %v3933_v10 }
 0xa20   :  { %3804 = vmatprep.subr.bf16.mxu1 %v3965_v4 }
 0xa23   :  { %3805 = vmatpush3.bf16.msra.mxu1 %v3934_v11 }
 0xa24   :  { %3806 = vmatprep.subr.bf16.mxu1 %v3965_v4 }
 0xa27   :  { %3807 = vmatpush3.bf16.msra.mxu1 %v3935_v54 }
 0xa28   :  { %3808 = vmatprep.subr.bf16.mxu1 %v3965_v4 }
 0xa2b   :  { %3809 = vmatpush3.bf16.msra.mxu1 %v3936_v27 }
 0xa2c   :  { %3814 = vmatprep.subr.bf16.mxu1 %v3965_v4 }
 0xada   :  { %v2845_v28 = vpop.f32.mrf.mxu0 }
 0xadb   :  { %2850 = vrot.lane.b32.xlu1 %v2845_v28, %s3971_s3 }
 0xadc   :  { %v3801_v29 = vpop.f32.mrf.mxu0 }
 0xade   :  { %v2700_v30 = vpop.f32.mrf.mxu1 }
 0xae0   :  { %v3761_v32 = vpop.f32.mrf.mxu1 }
 0xb4d   :  { %v2851_v31 = vpop.permute.xlu1 %2850 }
 0xb4e   :  { %v2853_v39 = vsel %vm5349_vm3, %v2700_v30, %v2851_v31 }
 0xb4f   :  { %v2862_v21 = vpack.c.bf16 %v2853_v39, %v2853_v39 }
 0xb51   :  { %3811 = vmatmul.mubr.msk.bf16.vlgmr.msra.gmra.mxu1 %vm5350_vm8, %v2862_v21 }
 0xb52   :  { %3815 = vmatpush3.bf16.msra.mxu1 %v3937_v17  ;;  %3818 = vmatprep.mubr.msk.bf16.mxu1 %vm5313_vm11, %v3965_v4  ;;  %vm3004_vm11 = vcmask 15360  }
 0xb53   :  { %3816 = vmatprep.subr.bf16.mxu1 %v3965_v4 }
 0xb56   :  { %3817 = vmatpush3.bf16.msra.mxu1 %v3938_v41 }
 0xc11   :  { %v2931_v45 = vpop.f32.mrf.mxu1 }
 0xc12   :  { %v2932_v37 = vadd.f32 %v3306_v44, %v2931_v45 }
 0xc13   :  { %v3812_v48 = vpop.f32.mrf.mxu1 }
 0xc14   :  { %v2937_v56 = vmax.f32 %v2932_v37, 0.0 }
 0xc15   :  { %v2934_v57 = vpop.f32.mrf.mxu1 }
 0xc16   :  { %v2942_v34 = vpack.c.bf16 %v2937_v56, %v2937_v56 }
 0xc17   :  { %v3813_v35 = vpop.f32.mrf.mxu1 }
 0xc18   :  { %3819 = vmatmul.mubr.msk.bf16.vlgmr.msra.gmra.mxu1 %vm5351_vm2, %v2942_v34 }
 0xcd8   :  { %v2992_v36 = vpop.f32.mrf.mxu1 }
 0xcd9   :  { %v2998_v4 = vsub.f32 0.0, %v2992_v36 }
 0xcda   :  { %v3820_v58 = vpop.f32.mrf.mxu1 }
 0xcdb   :  { %v2999_v2 = vmul.f32 1.442695, %v2998_v4 }
 0xcdc   :  { %v2995_v5 = vpop.f32.mrf.mxu1 }
 0xcdd   :  { %3959 = vpow2.f32 %v2999_v2 }
 0xcde   :  { %v3821_v60 = vpop.f32.mrf.mxu1 }
 0xcea   :  { %v3960_v51 = vpop.eup %3959 }
 0xceb   :  { %v3001_v7 = vadd.f32 1.0, %v3960_v51 }
 0xced   :  { %3961 = vrcp.f32 %v3001_v7 }
 0xcfa   :  { %v3962_v12 = vpop.eup %3961 }
 0xcfb   :  { %3005 = vst.msk [vmem:[%s5210_s25] sm:$0xff] %vm3004_vm11, %v3962_v12 }

</bundles_post_ra>
